<compile_context>
chip_gen: v7x
topology: tpu7x:2x2x1
jax: 0.10.0
libtpu: 0.0.40
codegen_flags: <defaults>
</compile_context>

<pallas_src>
import jax
import jax.numpy as jnp
from jax import lax
from jax.experimental import pallas as pl
from jax.experimental.pallas import tpu as pltpu

SELU_ALPHA = 1.6732632423543772
SELU_SCALE = 1.0507009873554805
LN_EPS = 1e-09

# Constant slab geometry: every slab holds a 4x4 content block + 1-cell halo.
_HS = 4                 # slab content side
_P = _HS + 2            # padded slab side (zero halo of 1)
_CELLS = _P * _P        # flattened padded cells per batch image

# ConvTranspose2d(k=4, s=2, p=1) taps: output row 2q+r receives input row q-s
# with kernel index _TAPK[r][s].
_TAPK = ({0: 1, 1: 3}, {0: 2, -1: 0})


def _selu(x):
    # scale * (max(x,0) + alpha * (exp(min(x,0)) - 1)) : exact SELU semantics.
    return SELU_SCALE * (jnp.maximum(x, 0.0)
                         + SELU_ALPHA * (jnp.exp(jnp.minimum(x, 0.0)) - 1.0))


def _arch(input_size, noise_dim, num_chan, hid_dim):
    mult = input_size // 8
    n_mid = mult.bit_length() - 1                 # number of middle ConvT blocks
    n_stages = n_mid + 1                          # middle blocks + final ConvT
    c_in = [hid_dim * (mult >> s) for s in range(n_stages)]
    c_out_mid = [hid_dim * (mult >> (s + 1)) for s in range(n_mid)]
    coutp_end = ((num_chan + 7) // 8) * 8         # pad end channels to sublane 8
    return mult, n_mid, n_stages, c_in, c_out_mid, coutp_end


def _slab_geometry(batch):
    win = batch * _CELLS                          # content+halo window (lanes)
    width = ((win + 2 * (_P + 1) + 127) // 128) * 128   # lane width, 128 multiple
    m0 = (width - win) // 2                       # left margin (>= P+1 for shifts)
    assert m0 >= _P + 1
    return win, width, m0


# ------------------------------ fused kernel ------------------------------- #

def _make_fused_kernel(batch, n_mid, c_in, c_out_mid, num_chan, coutp_end,
                       width, m0):
    n_stages = n_mid + 1
    win = batch * _CELLS

    def kernel(*refs):
        zexp_ref, wstart_ref, mask_ref = refs[:3]
        mid_refs = refs[3:3 + 3 * n_mid]          # (weight, ln_a, ln_b) per block
        wend_ref = refs[3 + 3 * n_mid]
        out_ref = refs[4 + 3 * n_mid]
        slab_refs = refs[5 + 3 * n_mid:]          # per-stage phase-slab scratch

        mask = mask_ref[...]                      # (1, win) content mask (f32)

        # Zero only the later-stage slabs (tiny); slab 0 is fully overwritten.
        for s in range(1, n_stages):
            for i in range(4 ** s):
                slab_refs[s][i] = jnp.zeros((c_in[s], width), jnp.bfloat16)

        # ---- Start: ConvT(noise -> c0, k4 s1 p0) + SELU, one full-width matmul.
        # zexp columns are exactly the stage-0 slab columns (halo/margin cols are
        # zero -> SELU(0)=0 keeps the halo zero): single contiguous store.
        act = jnp.dot(wstart_ref[...], zexp_ref[...],
                      preferred_element_type=jnp.float32)          # (c0, width)
        slab_refs[0][0] = _selu(act).astype(jnp.bfloat16)

        # ---- ConvTranspose2d(k4, s2, p1) stages in phase-slab form ----
        for s in range(n_stages):
            is_end = s == n_stages - 1
            nph = 1 << s                          # per-axis phase count of input
            src = slab_refs[s]
            if is_end:
                w_ref = wend_ref
                coutp, cout = coutp_end, num_chan
            else:
                w_ref = mid_refs[3 * s]
                a_ref = mid_refs[3 * s + 1]
                b_ref = mid_refs[3 * s + 2]
                coutp = cout = c_out_mid[s]       # multiple of 8 for hid_dim>=8

            for ay in range(nph):
                for ax in range(nph):
                    # Phase-fused matmuls: 9 taps of (4*coutp, cin)@(cin, win),
                    # each RHS a static lane-offset view of a source slab.
                    acc = None
                    for sy in (-1, 0, 1):
                        py, dy = (ay - sy) % nph, (ay - sy) // nph
                        for sx in (-1, 0, 1):
                            px, dx = (ax - sx) % nph, (ax - sx) // nph
                            off = dy * _P + dx
                            view = src[py * nph + px, :,
                                       m0 + off:m0 + off + win]
                            t = (sy + 1) * 3 + (sx + 1)
                            part = jnp.dot(w_ref[t], view,
                                           preferred_element_type=jnp.float32)
                            acc = part if acc is None else acc + part

                    if is_end:
                        # End block: Tanh; 4 phases stay stacked on sublanes and
                        # go straight to the (lane-dense) output slab.
                        row = (ay * nph + ax) * 4 * coutp
                        out_ref[row:row + 4 * coutp, m0:m0 + win] = jnp.tanh(acc)
                    else:
                        # Middle block: per output phase SELU -> LayerNormal
                        # (torch.std: unbiased, eps added to sigma) -> scale/shift
                        # -> masked (halo stays zero) bf16 store into the NEXT
                        # stage's input slab.  No pixel-shuffle scatter.
                        dst = slab_refs[s + 1]
                        for r in range(4):
                            ry, rx = r // 2, r % 2
                            h = _selu(acc[r * coutp:r * coutp + cout, :])
                            mu = jnp.mean(h, axis=0, keepdims=True)
                            var = jnp.sum((h - mu) ** 2, axis=0,
                                          keepdims=True) / (cout - 1)
                            inv = pl.reciprocal(jnp.sqrt(var) + LN_EPS,
                                                approx=True)
                            hn = (h - mu) * inv * a_ref[...] + b_ref[...]
                            # TODO(synk): torch Dropout2d(0.2) in training mode
                            # (random channel drop) is implemented as identity
                            # (eval semantics).
                            child = (2 * ay + ry) * (2 * nph) + (2 * ax + rx)
                            dst[child, :, m0:m0 + win] = (
                                hn * mask).astype(jnp.bfloat16)

    return kernel


# ------------------------ params (packed at init) --------------------------- #

def _pack_start_weight(w):
    """(noise, c0, 4, 4) -> (c0, noise*16) bf16, column = ci*16 + ky*4 + kx."""
    cin, cout = w.shape[0], w.shape[1]
    return jnp.transpose(w, (1, 0, 2, 3)).reshape(cout, cin * 16).astype(
        jnp.bfloat16)


def _pack_convT_phase_weight(w, coutp):
    """(Cin, Cout, 4, 4) -> (9, 4*coutp, Cin) bf16: per shift tap (sy,sx) a
    phase-stacked block; row block r=2ry+rx holds w[:,:,ky,kx].T when the tap
    contributes to output phase (ry,rx), else zeros."""
    cin, cout = w.shape[0], w.shape[1]
    wt = jnp.transpose(w, (2, 3, 1, 0))            # (ky, kx, cout, cin)
    mats = []
    for sy in (-1, 0, 1):
        for sx in (-1, 0, 1):
            m = jnp.zeros((4 * coutp, cin), jnp.float32)
            for ry in range(2):
                for rx in range(2):
                    if sy in _TAPK[ry] and sx in _TAPK[rx]:
                        ky, kx = _TAPK[ry][sy], _TAPK[rx][sx]
                        r = 2 * ry + rx
                        m = m.at[r * coutp:r * coutp + cout, :].set(wt[ky, kx])
            mats.append(m)
    return jnp.stack(mats).astype(jnp.bfloat16)


def init_params(key, input_size, noise_dim, num_chan, hid_dim):
    """weights_init: Conv* ~ N(0, 0.02); LayerNormal a_2 = 1, b_2 = 0.
    Returns raw (f32, torch-layout) weights plus pre-packed bf16 matmul operands."""
    mult, n_mid, _, _, c_out_mid, coutp_end = _arch(
        input_size, noise_dim, num_chan, hid_dim)
    keys = jax.random.split(key, n_mid + 2)

    raw = {'w_start': 0.02 * jax.random.normal(
        keys[0], (noise_dim, hid_dim * mult, 4, 4), jnp.float32),
        'w_mid': [], 'ln_a': [], 'ln_b': []}
    m = mult
    for i in range(n_mid):
        cin, cout = hid_dim * m, hid_dim * (m // 2)
        raw['w_mid'].append(0.02 * jax.random.normal(
            keys[1 + i], (cin, cout, 4, 4), jnp.float32))
        raw['ln_a'].append(jnp.ones((cout,), jnp.float32))
        raw['ln_b'].append(jnp.zeros((cout,), jnp.float32))
        m //= 2
    raw['w_end'] = 0.02 * jax.random.normal(
        keys[n_mid + 1], (hid_dim, num_chan, 4, 4), jnp.float32)

    packed = {
        'w_start': _pack_start_weight(raw['w_start']),
        'w_mid': [_pack_convT_phase_weight(raw['w_mid'][i], c_out_mid[i])
                  for i in range(n_mid)],
        'ln_a': [a.reshape(-1, 1) for a in raw['ln_a']],
        'ln_b': [b.reshape(-1, 1) for b in raw['ln_b']],
        'w_end': _pack_convT_phase_weight(raw['w_end'], coutp_end),
    }
    return {'raw': raw, 'packed': packed}


# ------------------------------- forward ------------------------------------ #

def _build_zexp(x, noise_dim, batch, m0, width):
    """Pre-place the latent into the stage-0 slab layout (layout plumbing only):
    row = ci*16 + ky*4 + kx, column = m0 + b*36 + (ky+1)*6 + (kx+1)."""
    zt = x.reshape(batch, noise_dim).T.astype(jnp.float32)          # (noise, B)
    k = jnp.arange(16)
    cell = (k // 4 + 1) * _P + (k % 4 + 1)                          # (16,)
    onehot = (cell[:, None] == jnp.arange(_CELLS)[None, :]).astype(jnp.float32)
    z4 = jnp.einsum('cb,kp->ckbp', zt, onehot)                      # (n,16,B,36)
    zflat = z4.reshape(noise_dim * 16, batch * _CELLS)
    zexp = jnp.pad(zflat, ((0, 0), (m0, width - m0 - batch * _CELLS)))
    return zexp.astype(jnp.bfloat16)


def _build_content_mask(batch):
    rel = jnp.arange(batch * _CELLS)
    pos = rel % _CELLS
    y = pos // _P
    x = pos % _P
    m = (y >= 1) & (y <= _HS) & (x >= 1) & (x <= _HS)
    return m.astype(jnp.float32)[None, :]


def dcgan_g_forward(x, packed, input_size, noise_dim, num_chan, hid_dim):
    batch = x.shape[0]
    _, n_mid, n_stages, c_in, c_out_mid, coutp_end = _arch(
        input_size, noise_dim, num_chan, hid_dim)
    win, width, m0 = _slab_geometry(batch)

    zexp = _build_zexp(x, noise_dim, batch, m0, width)
    mask = _build_content_mask(batch)

    inputs = [zexp, packed['w_start'], mask]
    for i in range(n_mid):
        inputs += [packed['w_mid'][i], packed['ln_a'][i], packed['ln_b'][i]]
    inputs.append(packed['w_end'])

    # bf16 phase-slab scratch: stage s holds 4^s slabs of (c_in[s], width).
    scratch_shapes = [pltpu.VMEM((4 ** s, c_in[s], width), jnp.bfloat16)
                      for s in range(n_stages)]
    n_pieces = 4 ** n_mid * 4
    out_shape = jax.ShapeDtypeStruct((n_pieces * coutp_end, width), jnp.float32)

    out_k = pl.pallas_call(
        _make_fused_kernel(batch, n_mid, c_in, c_out_mid, num_chan, coutp_end,
                           width, m0),
        out_shape=out_shape,
        in_specs=[pl.BlockSpec(memory_space=pltpu.MemorySpace.VMEM)] * len(inputs),
        out_specs=pl.BlockSpec(memory_space=pltpu.MemorySpace.VMEM),
        scratch_shapes=scratch_shapes,
    )(*inputs)

    # Phase-slab kernel output -> NCHW image (pure layout plumbing, wrapper-side).
    S = 2 ** n_mid
    o = out_k[:, m0:m0 + win]
    o = o.reshape(S, S, 2, 2, coutp_end, batch, _P, _P)
    o = o[:, :, :, :, :num_chan, :, 1:1 + _HS, 1:1 + _HS]   # (ay,ax,ry,rx,c,b,u,v)
    img = jnp.transpose(o, (5, 4, 6, 0, 2, 7, 1, 3))        # (b,c,u,ay,ry,v,ax,rx)
    return img.reshape(batch, num_chan, input_size, input_size)


# -------------------------- plain-JAX reference ----------------------------- #

def _convT_ref(x, w, stride, padding):
    k = w.shape[-1]
    ker = jnp.transpose(jnp.flip(w, (2, 3)), (1, 0, 2, 3))
    pad = k - 1 - padding
    return lax.conv_general_dilated(
        x, ker, window_strides=(1, 1), padding=[(pad, pad), (pad, pad)],
        lhs_dilation=(stride, stride),
        dimension_numbers=('NCHW', 'OIHW', 'NCHW'))


def _reference_forward(x, raw, input_size, noise_dim, num_chan, hid_dim):
    """XLA reference with matching bf16 operand quantization (NCHW)."""
    def qf(a):
        return a.astype(jnp.bfloat16).astype(jnp.float32)

    batch = x.shape[0]
    h = x.reshape(batch, noise_dim, 1, 1)
    h = _selu(_convT_ref(qf(h), qf(raw['w_start']), 1, 0))
    mult = input_size // 8
    i = 0
    while mult > 1:
        h = _selu(_convT_ref(qf(h), qf(raw['w_mid'][i]), 2, 1))
        mu = jnp.mean(h, axis=1, keepdims=True)
        sigma = jnp.sqrt(jnp.sum((h - mu) ** 2, axis=1, keepdims=True)
                         / (h.shape[1] - 1))
        h = (h - mu) / (sigma + LN_EPS)
        h = (h * raw['ln_a'][i].reshape(1, -1, 1, 1)
             + raw['ln_b'][i].reshape(1, -1, 1, 1))
        mult //= 2
        i += 1
    return jnp.tanh(_convT_ref(qf(h), qf(raw['w_end']), 2, 1))


if __name__ == "__main__":
    # Small shapes consistent with the module: input_size=16 -> mult=2.
    input_size, noise_dim, num_chan, hid_dim = 16, 8, 3, 8
    batch = 2

    key = jax.random.PRNGKey(0)
    k_x, k_p = jax.random.split(key)
    x = jax.random.normal(k_x, (batch, noise_dim, 1, 1), jnp.float32)
    params = init_params(k_p, input_size, noise_dim, num_chan, hid_dim)

    fwd = jax.jit(lambda xx, pp: dcgan_g_forward(
        xx, pp, input_size, noise_dim, num_chan, hid_dim))
    out = jax.block_until_ready(fwd(x, params['packed']))

    assert out.shape == (batch, num_chan, input_size, input_size), out.shape
    assert bool(jnp.all(jnp.isfinite(out)))
    assert bool(jnp.all(jnp.abs(out) <= 1.0 + 1e-6))      # tanh output range

    # Numerical check against a plain-JAX (XLA) reference of the same module.
    ref = _reference_forward(x, params['raw'], input_size, noise_dim, num_chan,
                             hid_dim)
    max_err = float(jnp.max(jnp.abs(out - ref)))
    assert max_err < 2e-2, max_err

    print("KERNEL_OK")
</pallas_src>

<mosaic_0001>
module attributes {stable_mosaic.version = 11 : i64} {
  func.func @kernel(%arg0: memref<128x128xbf16, #tpu.memory_space<vmem>>, %arg1: memref<16x128xbf16, #tpu.memory_space<vmem>>, %arg2: memref<1x72xf32, #tpu.memory_space<vmem>>, %arg3: memref<9x32x16xbf16, #tpu.memory_space<vmem>>, %arg4: memref<8x1xf32, #tpu.memory_space<vmem>>, %arg5: memref<8x1xf32, #tpu.memory_space<vmem>>, %arg6: memref<9x32x8xbf16, #tpu.memory_space<vmem>>, %arg7: memref<128x128xf32, #tpu.memory_space<vmem>>, %arg8: memref<1x16x128xbf16, #tpu.memory_space<vmem>>, %arg9: memref<4x8x128xbf16, #tpu.memory_space<vmem>>) attributes {dimension_semantics = [], scalar_prefetch = 0 : i64, scratch_operands = 2 : i64, tpu.core_type = #tpu.core_type<tc>} {
    %c0 = arith.constant 0 : index
    %c0_0 = arith.constant 0 : index
    %0 = vector.load %arg2[%c0, %c0_0] : memref<1x72xf32, #tpu.memory_space<vmem>>, vector<1x72xf32>
    %cst = arith.constant 0.000000e+00 : bf16
    %1 = vector.broadcast %cst : bf16 to vector<8x128xbf16>
    %c0_1 = arith.constant 0 : index
    %c0_2 = arith.constant 0 : index
    %c0_3 = arith.constant 0 : index
    %2 = vector.load %arg9[%c0_1, %c0_2, %c0_3] : memref<4x8x128xbf16, #tpu.memory_space<vmem>>, vector<1x8x128xbf16>
    %3 = vector.shape_cast %2 : vector<1x8x128xbf16> to vector<8x128xbf16>
    %4 = vector.shape_cast %1 : vector<8x128xbf16> to vector<1x8x128xbf16>
    tpu.vector_store %arg9[%c0_1, %c0_2, %c0_3], %4 {strides = array<i32>} : memref<4x8x128xbf16, #tpu.memory_space<vmem>>, vector<1x8x128xbf16>,
    %cst_4 = arith.constant 0.000000e+00 : bf16
    %5 = vector.broadcast %cst_4 : bf16 to vector<8x128xbf16>
    %c1 = arith.constant 1 : index
    %c0_5 = arith.constant 0 : index
    %c0_6 = arith.constant 0 : index
    %6 = vector.load %arg9[%c1, %c0_5, %c0_6] : memref<4x8x128xbf16, #tpu.memory_space<vmem>>, vector<1x8x128xbf16>
    %7 = vector.shape_cast %6 : vector<1x8x128xbf16> to vector<8x128xbf16>
    %8 = vector.shape_cast %5 : vector<8x128xbf16> to vector<1x8x128xbf16>
    tpu.vector_store %arg9[%c1, %c0_5, %c0_6], %8 {strides = array<i32>} : memref<4x8x128xbf16, #tpu.memory_space<vmem>>, vector<1x8x128xbf16>,
    %cst_7 = arith.constant 0.000000e+00 : bf16
    %9 = vector.broadcast %cst_7 : bf16 to vector<8x128xbf16>
    %c2 = arith.constant 2 : index
    %c0_8 = arith.constant 0 : index
    %c0_9 = arith.constant 0 : index
    %10 = vector.load %arg9[%c2, %c0_8, %c0_9] : memref<4x8x128xbf16, #tpu.memory_space<vmem>>, vector<1x8x128xbf16>
    %11 = vector.shape_cast %10 : vector<1x8x128xbf16> to vector<8x128xbf16>
    %12 = vector.shape_cast %9 : vector<8x128xbf16> to vector<1x8x128xbf16>
    tpu.vector_store %arg9[%c2, %c0_8, %c0_9], %12 {strides = array<i32>} : memref<4x8x128xbf16, #tpu.memory_space<vmem>>, vector<1x8x128xbf16>,
    %cst_10 = arith.constant 0.000000e+00 : bf16
    %13 = vector.broadcast %cst_10 : bf16 to vector<8x128xbf16>
    %c3 = arith.constant 3 : index
    %c0_11 = arith.constant 0 : index
    %c0_12 = arith.constant 0 : index
    %14 = vector.load %arg9[%c3, %c0_11, %c0_12] : memref<4x8x128xbf16, #tpu.memory_space<vmem>>, vector<1x8x128xbf16>
    %15 = vector.shape_cast %14 : vector<1x8x128xbf16> to vector<8x128xbf16>
    %16 = vector.shape_cast %13 : vector<8x128xbf16> to vector<1x8x128xbf16>
    tpu.vector_store %arg9[%c3, %c0_11, %c0_12], %16 {strides = array<i32>} : memref<4x8x128xbf16, #tpu.memory_space<vmem>>, vector<1x8x128xbf16>,
    %c0_13 = arith.constant 0 : index
    %c0_14 = arith.constant 0 : index
    %17 = vector.load %arg1[%c0_13, %c0_14] : memref<16x128xbf16, #tpu.memory_space<vmem>>, vector<16x128xbf16>
    %c0_15 = arith.constant 0 : index
    %c0_16 = arith.constant 0 : index
    %18 = vector.load %arg0[%c0_15, %c0_16] : memref<128x128xbf16, #tpu.memory_space<vmem>>, vector<128x128xbf16>
    %cst_17 = arith.constant dense<0.000000e+00> : vector<16x128xf32>
    %19 = tpu.matmul %17, %18, %cst_17 {dimension_numbers = #tpu.dot_dimension_numbers<[1], [0], [0], [1], [0, 0, 1, 1], [], []>} : vector<16x128xbf16>, vector<128x128xbf16>, vector<16x128xf32> -> vector<16x128xf32>
    %cst_18 = arith.constant 0.000000e+00 : f32
    %20 = vector.broadcast %cst_18 : f32 to vector<16x128xf32>
    %21 = arith.maximumf %19, %20 : vector<16x128xf32>
    %cst_19 = arith.constant 0.000000e+00 : f32
    %22 = vector.broadcast %cst_19 : f32 to vector<16x128xf32>
    %23 = arith.minimumf %19, %22 : vector<16x128xf32>
    %24 = math.exp %23 : vector<16x128xf32>
    %cst_20 = arith.constant 1.000000e+00 : f32
    %25 = vector.broadcast %cst_20 : f32 to vector<16x128xf32>
    %26 = arith.subf %24, %25 : vector<16x128xf32>
    %cst_21 = arith.constant 1.67326319 : f32
    %27 = vector.broadcast %cst_21 : f32 to vector<16x128xf32>
    %28 = arith.mulf %27, %26 : vector<16x128xf32>
    %29 = arith.addf %21, %28 : vector<16x128xf32>
    %cst_22 = arith.constant 1.05070102 : f32
    %30 = vector.broadcast %cst_22 : f32 to vector<16x128xf32>
    %31 = arith.mulf %30, %29 : vector<16x128xf32>
    %32 = arith.truncf %31 : vector<16x128xf32> to vector<16x128xbf16>
    %c0_23 = arith.constant 0 : index
    %c0_24 = arith.constant 0 : index
    %c0_25 = arith.constant 0 : index
    %33 = vector.load %arg8[%c0_23, %c0_24, %c0_25] : memref<1x16x128xbf16, #tpu.memory_space<vmem>>, vector<1x16x128xbf16>
    %34 = vector.shape_cast %33 : vector<1x16x128xbf16> to vector<16x128xbf16>
    %35 = vector.shape_cast %32 : vector<16x128xbf16> to vector<1x16x128xbf16>
    tpu.vector_store %arg8[%c0_23, %c0_24, %c0_25], %35 {strides = array<i32>} : memref<1x16x128xbf16, #tpu.memory_space<vmem>>, vector<1x16x128xbf16>,
    %c0_26 = arith.constant 0 : index
    %c0_27 = arith.constant 0 : index
    %c35 = arith.constant 35 : index
    %36 = vector.load %arg8[%c0_26, %c0_27, %c35] : memref<1x16x128xbf16, #tpu.memory_space<vmem>>, vector<1x16x72xbf16>
    %37 = vector.shape_cast %36 : vector<1x16x72xbf16> to vector<16x72xbf16>
    %c0_28 = arith.constant 0 : index
    %c0_29 = arith.constant 0 : index
    %c0_30 = arith.constant 0 : index
    %38 = vector.load %arg3[%c0_28, %c0_29, %c0_30] : memref<9x32x16xbf16, #tpu.memory_space<vmem>>, vector<1x32x16xbf16>
    %39 = vector.shape_cast %38 : vector<1x32x16xbf16> to vector<32x16xbf16>
    %cst_31 = arith.constant dense<0.000000e+00> : vector<32x72xf32>
    %40 = tpu.matmul %39, %37, %cst_31 {dimension_numbers = #tpu.dot_dimension_numbers<[1], [0], [0], [1], [0, 0, 1, 1], [], []>} : vector<32x16xbf16>, vector<16x72xbf16>, vector<32x72xf32> -> vector<32x72xf32>
    %c0_32 = arith.constant 0 : index
    %c0_33 = arith.constant 0 : index
    %c34 = arith.constant 34 : index
    %41 = vector.load %arg8[%c0_32, %c0_33, %c34] : memref<1x16x128xbf16, #tpu.memory_space<vmem>>, vector<1x16x72xbf16>
    %42 = vector.shape_cast %41 : vector<1x16x72xbf16> to vector<16x72xbf16>
    %c1_34 = arith.constant 1 : index
    %c0_35 = arith.constant 0 : index
    %c0_36 = arith.constant 0 : index
    %43 = vector.load %arg3[%c1_34, %c0_35, %c0_36] : memref<9x32x16xbf16, #tpu.memory_space<vmem>>, vector<1x32x16xbf16>
    %44 = vector.shape_cast %43 : vector<1x32x16xbf16> to vector<32x16xbf16>
    %cst_37 = arith.constant dense<0.000000e+00> : vector<32x72xf32>
    %45 = tpu.matmul %44, %42, %cst_37 {dimension_numbers = #tpu.dot_dimension_numbers<[1], [0], [0], [1], [0, 0, 1, 1], [], []>} : vector<32x16xbf16>, vector<16x72xbf16>, vector<32x72xf32> -> vector<32x72xf32>
    %46 = arith.addf %40, %45 : vector<32x72xf32>
    %c0_38 = arith.constant 0 : index
    %c0_39 = arith.constant 0 : index
    %c33 = arith.constant 33 : index
    %47 = vector.load %arg8[%c0_38, %c0_39, %c33] : memref<1x16x128xbf16, #tpu.memory_space<vmem>>, vector<1x16x72xbf16>
    %48 = vector.shape_cast %47 : vector<1x16x72xbf16> to vector<16x72xbf16>
    %c2_40 = arith.constant 2 : index
    %c0_41 = arith.constant 0 : index
    %c0_42 = arith.constant 0 : index
    %49 = vector.load %arg3[%c2_40, %c0_41, %c0_42] : memref<9x32x16xbf16, #tpu.memory_space<vmem>>, vector<1x32x16xbf16>
    %50 = vector.shape_cast %49 : vector<1x32x16xbf16> to vector<32x16xbf16>
    %cst_43 = arith.constant dense<0.000000e+00> : vector<32x72xf32>
    %51 = tpu.matmul %50, %48, %cst_43 {dimension_numbers = #tpu.dot_dimension_numbers<[1], [0], [0], [1], [0, 0, 1, 1], [], []>} : vector<32x16xbf16>, vector<16x72xbf16>, vector<32x72xf32> -> vector<32x72xf32>
    %52 = arith.addf %46, %51 : vector<32x72xf32>
    %c0_44 = arith.constant 0 : index
    %c0_45 = arith.constant 0 : index
    %c29 = arith.constant 29 : index
    %53 = vector.load %arg8[%c0_44, %c0_45, %c29] : memref<1x16x128xbf16, #tpu.memory_space<vmem>>, vector<1x16x72xbf16>
    %54 = vector.shape_cast %53 : vector<1x16x72xbf16> to vector<16x72xbf16>
    %c3_46 = arith.constant 3 : index
    %c0_47 = arith.constant 0 : index
    %c0_48 = arith.constant 0 : index
    %55 = vector.load %arg3[%c3_46, %c0_47, %c0_48] : memref<9x32x16xbf16, #tpu.memory_space<vmem>>, vector<1x32x16xbf16>
    %56 = vector.shape_cast %55 : vector<1x32x16xbf16> to vector<32x16xbf16>
    %cst_49 = arith.constant dense<0.000000e+00> : vector<32x72xf32>
    %57 = tpu.matmul %56, %54, %cst_49 {dimension_numbers = #tpu.dot_dimension_numbers<[1], [0], [0], [1], [0, 0, 1, 1], [], []>} : vector<32x16xbf16>, vector<16x72xbf16>, vector<32x72xf32> -> vector<32x72xf32>
    %58 = arith.addf %52, %57 : vector<32x72xf32>
    %c0_50 = arith.constant 0 : index
    %c0_51 = arith.constant 0 : index
    %c28 = arith.constant 28 : index
    %59 = vector.load %arg8[%c0_50, %c0_51, %c28] : memref<1x16x128xbf16, #tpu.memory_space<vmem>>, vector<1x16x72xbf16>
    %60 = vector.shape_cast %59 : vector<1x16x72xbf16> to vector<16x72xbf16>
    %c4 = arith.constant 4 : index
    %c0_52 = arith.constant 0 : index
    %c0_53 = arith.constant 0 : index
    %61 = vector.load %arg3[%c4, %c0_52, %c0_53] : memref<9x32x16xbf16, #tpu.memory_space<vmem>>, vector<1x32x16xbf16>
    %62 = vector.shape_cast %61 : vector<1x32x16xbf16> to vector<32x16xbf16>
    %cst_54 = arith.constant dense<0.000000e+00> : vector<32x72xf32>
    %63 = tpu.matmul %62, %60, %cst_54 {dimension_numbers = #tpu.dot_dimension_numbers<[1], [0], [0], [1], [0, 0, 1, 1], [], []>} : vector<32x16xbf16>, vector<16x72xbf16>, vector<32x72xf32> -> vector<32x72xf32>
    %64 = arith.addf %58, %63 : vector<32x72xf32>
    %c0_55 = arith.constant 0 : index
    %c0_56 = arith.constant 0 : index
    %c27 = arith.constant 27 : index
    %65 = vector.load %arg8[%c0_55, %c0_56, %c27] : memref<1x16x128xbf16, #tpu.memory_space<vmem>>, vector<1x16x72xbf16>
    %66 = vector.shape_cast %65 : vector<1x16x72xbf16> to vector<16x72xbf16>
    %c5 = arith.constant 5 : index
    %c0_57 = arith.constant 0 : index
    %c0_58 = arith.constant 0 : index
    %67 = vector.load %arg3[%c5, %c0_57, %c0_58] : memref<9x32x16xbf16, #tpu.memory_space<vmem>>, vector<1x32x16xbf16>
    %68 = vector.shape_cast %67 : vector<1x32x16xbf16> to vector<32x16xbf16>
    %cst_59 = arith.constant dense<0.000000e+00> : vector<32x72xf32>
    %69 = tpu.matmul %68, %66, %cst_59 {dimension_numbers = #tpu.dot_dimension_numbers<[1], [0], [0], [1], [0, 0, 1, 1], [], []>} : vector<32x16xbf16>, vector<16x72xbf16>, vector<32x72xf32> -> vector<32x72xf32>
    %70 = arith.addf %64, %69 : vector<32x72xf32>
    %c0_60 = arith.constant 0 : index
    %c0_61 = arith.constant 0 : index
    %c23 = arith.constant 23 : index
    %71 = vector.load %arg8[%c0_60, %c0_61, %c23] : memref<1x16x128xbf16, #tpu.memory_space<vmem>>, vector<1x16x72xbf16>
    %72 = vector.shape_cast %71 : vector<1x16x72xbf16> to vector<16x72xbf16>
    %c6 = arith.constant 6 : index
    %c0_62 = arith.constant 0 : index
    %c0_63 = arith.constant 0 : index
    %73 = vector.load %arg3[%c6, %c0_62, %c0_63] : memref<9x32x16xbf16, #tpu.memory_space<vmem>>, vector<1x32x16xbf16>
    %74 = vector.shape_cast %73 : vector<1x32x16xbf16> to vector<32x16xbf16>
    %cst_64 = arith.constant dense<0.000000e+00> : vector<32x72xf32>
    %75 = tpu.matmul %74, %72, %cst_64 {dimension_numbers = #tpu.dot_dimension_numbers<[1], [0], [0], [1], [0, 0, 1, 1], [], []>} : vector<32x16xbf16>, vector<16x72xbf16>, vector<32x72xf32> -> vector<32x72xf32>
    %76 = arith.addf %70, %75 : vector<32x72xf32>
    %c0_65 = arith.constant 0 : index
    %c0_66 = arith.constant 0 : index
    %c22 = arith.constant 22 : index
    %77 = vector.load %arg8[%c0_65, %c0_66, %c22] : memref<1x16x128xbf16, #tpu.memory_space<vmem>>, vector<1x16x72xbf16>
    %78 = vector.shape_cast %77 : vector<1x16x72xbf16> to vector<16x72xbf16>
    %c7 = arith.constant 7 : index
    %c0_67 = arith.constant 0 : index
    %c0_68 = arith.constant 0 : index
    %79 = vector.load %arg3[%c7, %c0_67, %c0_68] : memref<9x32x16xbf16, #tpu.memory_space<vmem>>, vector<1x32x16xbf16>
    %80 = vector.shape_cast %79 : vector<1x32x16xbf16> to vector<32x16xbf16>
    %cst_69 = arith.constant dense<0.000000e+00> : vector<32x72xf32>
    %81 = tpu.matmul %80, %78, %cst_69 {dimension_numbers = #tpu.dot_dimension_numbers<[1], [0], [0], [1], [0, 0, 1, 1], [], []>} : vector<32x16xbf16>, vector<16x72xbf16>, vector<32x72xf32> -> vector<32x72xf32>
    %82 = arith.addf %76, %81 : vector<32x72xf32>
    %c0_70 = arith.constant 0 : index
    %c0_71 = arith.constant 0 : index
    %c21 = arith.constant 21 : index
    %83 = vector.load %arg8[%c0_70, %c0_71, %c21] : memref<1x16x128xbf16, #tpu.memory_space<vmem>>, vector<1x16x72xbf16>
    %84 = vector.shape_cast %83 : vector<1x16x72xbf16> to vector<16x72xbf16>
    %c8 = arith.constant 8 : index
    %c0_72 = arith.constant 0 : index
    %c0_73 = arith.constant 0 : index
    %85 = vector.load %arg3[%c8, %c0_72, %c0_73] : memref<9x32x16xbf16, #tpu.memory_space<vmem>>, vector<1x32x16xbf16>
    %86 = vector.shape_cast %85 : vector<1x32x16xbf16> to vector<32x16xbf16>
    %cst_74 = arith.constant dense<0.000000e+00> : vector<32x72xf32>
    %87 = tpu.matmul %86, %84, %cst_74 {dimension_numbers = #tpu.dot_dimension_numbers<[1], [0], [0], [1], [0, 0, 1, 1], [], []>} : vector<32x16xbf16>, vector<16x72xbf16>, vector<32x72xf32> -> vector<32x72xf32>
    %88 = arith.addf %82, %87 : vector<32x72xf32>
    %89 = vector.extract_strided_slice %88 {offsets = [0, 0], sizes = [8, 72], strides = [1, 1]} : vector<32x72xf32> to vector<8x72xf32>
    %cst_75 = arith.constant 0.000000e+00 : f32
    %90 = vector.broadcast %cst_75 : f32 to vector<8x72xf32>
    %91 = arith.maximumf %89, %90 : vector<8x72xf32>
    %cst_76 = arith.constant 0.000000e+00 : f32
    %92 = vector.broadcast %cst_76 : f32 to vector<8x72xf32>
    %93 = arith.minimumf %89, %92 : vector<8x72xf32>
    %94 = math.exp %93 : vector<8x72xf32>
    %cst_77 = arith.constant 1.000000e+00 : f32
    %95 = vector.broadcast %cst_77 : f32 to vector<8x72xf32>
    %96 = arith.subf %94, %95 : vector<8x72xf32>
    %cst_78 = arith.constant 1.67326319 : f32
    %97 = vector.broadcast %cst_78 : f32 to vector<8x72xf32>
    %98 = arith.mulf %97, %96 : vector<8x72xf32>
    %99 = arith.addf %91, %98 : vector<8x72xf32>
    %cst_79 = arith.constant 1.05070102 : f32
    %100 = vector.broadcast %cst_79 : f32 to vector<8x72xf32>
    %101 = arith.mulf %100, %99 : vector<8x72xf32>
    %cst_80 = arith.constant dense<0.000000e+00> : vector<72xf32>
    %102 = vector.multi_reduction <add>, %101, %cst_80 [0] : vector<8x72xf32> to vector<72xf32>
    %103 = vector.shape_cast %102 : vector<72xf32> to vector<1x72xf32>
    %cst_81 = arith.constant 8.000000e+00 : f32
    %104 = vector.broadcast %cst_81 : f32 to vector<1x72xf32>
    %105 = arith.divf %103, %104 : vector<1x72xf32>
    %106 = vector.broadcast %105 : vector<1x72xf32> to vector<8x72xf32>
    %107 = arith.subf %101, %106 : vector<8x72xf32>
    %108 = arith.mulf %107, %107 : vector<8x72xf32>
    %cst_82 = arith.constant dense<0.000000e+00> : vector<72xf32>
    %109 = vector.multi_reduction <add>, %108, %cst_82 [0] : vector<8x72xf32> to vector<72xf32>
    %110 = vector.shape_cast %109 : vector<72xf32> to vector<1x72xf32>
    %cst_83 = arith.constant 7.000000e+00 : f32
    %111 = vector.broadcast %cst_83 : f32 to vector<1x72xf32>
    %112 = arith.divf %110, %111 : vector<1x72xf32>
    %113 = math.sqrt %112 : vector<1x72xf32>
    %cst_84 = arith.constant 9.99999971E-10 : f32
    %114 = vector.broadcast %cst_84 : f32 to vector<1x72xf32>
    %115 = arith.addf %113, %114 : vector<1x72xf32>
    %116 = tpu.reciprocal %115 {approx = true} : vector<1x72xf32> -> vector<1x72xf32>
    %117 = vector.broadcast %105 : vector<1x72xf32> to vector<8x72xf32>
    %118 = arith.subf %101, %117 : vector<8x72xf32>
    %119 = vector.broadcast %116 : vector<1x72xf32> to vector<8x72xf32>
    %120 = arith.mulf %118, %119 : vector<8x72xf32>
    %c0_85 = arith.constant 0 : index
    %c0_86 = arith.constant 0 : index
    %121 = vector.load %arg4[%c0_85, %c0_86] : memref<8x1xf32, #tpu.memory_space<vmem>>, vector<8x1xf32>
    %122 = vector.broadcast %121 : vector<8x1xf32> to vector<8x72xf32>
    %123 = arith.mulf %120, %122 : vector<8x72xf32>
    %c0_87 = arith.constant 0 : index
    %c0_88 = arith.constant 0 : index
    %124 = vector.load %arg5[%c0_87, %c0_88] : memref<8x1xf32, #tpu.memory_space<vmem>>, vector<8x1xf32>
    %125 = vector.broadcast %124 : vector<8x1xf32> to vector<8x72xf32>
    %126 = arith.addf %123, %125 : vector<8x72xf32>
    %127 = vector.broadcast %0 : vector<1x72xf32> to vector<8x72xf32>
    %128 = arith.mulf %126, %127 : vector<8x72xf32>
    %129 = arith.truncf %128 : vector<8x72xf32> to vector<8x72xbf16>
    %c0_89 = arith.constant 0 : index
    %c0_90 = arith.constant 0 : index
    %c28_91 = arith.constant 28 : index
    %130 = vector.load %arg9[%c0_89, %c0_90, %c28_91] : memref<4x8x128xbf16, #tpu.memory_space<vmem>>, vector<1x8x72xbf16>
    %131 = vector.shape_cast %130 : vector<1x8x72xbf16> to vector<8x72xbf16>
    %132 = vector.shape_cast %129 : vector<8x72xbf16> to vector<1x8x72xbf16>
    tpu.vector_store %arg9[%c0_89, %c0_90, %c28_91], %132 {strides = array<i32>} : memref<4x8x128xbf16, #tpu.memory_space<vmem>>, vector<1x8x72xbf16>,
    %133 = vector.extract_strided_slice %88 {offsets = [8, 0], sizes = [8, 72], strides = [1, 1]} : vector<32x72xf32> to vector<8x72xf32>
    %cst_92 = arith.constant 0.000000e+00 : f32
    %134 = vector.broadcast %cst_92 : f32 to vector<8x72xf32>
    %135 = arith.maximumf %133, %134 : vector<8x72xf32>
    %cst_93 = arith.constant 0.000000e+00 : f32
    %136 = vector.broadcast %cst_93 : f32 to vector<8x72xf32>
    %137 = arith.minimumf %133, %136 : vector<8x72xf32>
    %138 = math.exp %137 : vector<8x72xf32>
    %cst_94 = arith.constant 1.000000e+00 : f32
    %139 = vector.broadcast %cst_94 : f32 to vector<8x72xf32>
    %140 = arith.subf %138, %139 : vector<8x72xf32>
    %cst_95 = arith.constant 1.67326319 : f32
    %141 = vector.broadcast %cst_95 : f32 to vector<8x72xf32>
    %142 = arith.mulf %141, %140 : vector<8x72xf32>
    %143 = arith.addf %135, %142 : vector<8x72xf32>
    %cst_96 = arith.constant 1.05070102 : f32
    %144 = vector.broadcast %cst_96 : f32 to vector<8x72xf32>
    %145 = arith.mulf %144, %143 : vector<8x72xf32>
    %cst_97 = arith.constant dense<0.000000e+00> : vector<72xf32>
    %146 = vector.multi_reduction <add>, %145, %cst_97 [0] : vector<8x72xf32> to vector<72xf32>
    %147 = vector.shape_cast %146 : vector<72xf32> to vector<1x72xf32>
    %cst_98 = arith.constant 8.000000e+00 : f32
    %148 = vector.broadcast %cst_98 : f32 to vector<1x72xf32>
    %149 = arith.divf %147, %148 : vector<1x72xf32>
    %150 = vector.broadcast %149 : vector<1x72xf32> to vector<8x72xf32>
    %151 = arith.subf %145, %150 : vector<8x72xf32>
    %152 = arith.mulf %151, %151 : vector<8x72xf32>
    %cst_99 = arith.constant dense<0.000000e+00> : vector<72xf32>
    %153 = vector.multi_reduction <add>, %152, %cst_99 [0] : vector<8x72xf32> to vector<72xf32>
    %154 = vector.shape_cast %153 : vector<72xf32> to vector<1x72xf32>
    %cst_100 = arith.constant 7.000000e+00 : f32
    %155 = vector.broadcast %cst_100 : f32 to vector<1x72xf32>
    %156 = arith.divf %154, %155 : vector<1x72xf32>
    %157 = math.sqrt %156 : vector<1x72xf32>
    %cst_101 = arith.constant 9.99999971E-10 : f32
    %158 = vector.broadcast %cst_101 : f32 to vector<1x72xf32>
    %159 = arith.addf %157, %158 : vector<1x72xf32>
    %160 = tpu.reciprocal %159 {approx = true} : vector<1x72xf32> -> vector<1x72xf32>
    %161 = vector.broadcast %149 : vector<1x72xf32> to vector<8x72xf32>
    %162 = arith.subf %145, %161 : vector<8x72xf32>
    %163 = vector.broadcast %160 : vector<1x72xf32> to vector<8x72xf32>
    %164 = arith.mulf %162, %163 : vector<8x72xf32>
    %c0_102 = arith.constant 0 : index
    %c0_103 = arith.constant 0 : index
    %165 = vector.load %arg4[%c0_102, %c0_103] : memref<8x1xf32, #tpu.memory_space<vmem>>, vector<8x1xf32>
    %166 = vector.broadcast %165 : vector<8x1xf32> to vector<8x72xf32>
    %167 = arith.mulf %164, %166 : vector<8x72xf32>
    %c0_104 = arith.constant 0 : index
    %c0_105 = arith.constant 0 : index
    %168 = vector.load %arg5[%c0_104, %c0_105] : memref<8x1xf32, #tpu.memory_space<vmem>>, vector<8x1xf32>
    %169 = vector.broadcast %168 : vector<8x1xf32> to vector<8x72xf32>
    %170 = arith.addf %167, %169 : vector<8x72xf32>
    %171 = vector.broadcast %0 : vector<1x72xf32> to vector<8x72xf32>
    %172 = arith.mulf %170, %171 : vector<8x72xf32>
    %173 = arith.truncf %172 : vector<8x72xf32> to vector<8x72xbf16>
    %c1_106 = arith.constant 1 : index
    %c0_107 = arith.constant 0 : index
    %c28_108 = arith.constant 28 : index
    %174 = vector.load %arg9[%c1_106, %c0_107, %c28_108] : memref<4x8x128xbf16, #tpu.memory_space<vmem>>, vector<1x8x72xbf16>
    %175 = vector.shape_cast %174 : vector<1x8x72xbf16> to vector<8x72xbf16>
    %176 = vector.shape_cast %173 : vector<8x72xbf16> to vector<1x8x72xbf16>
    tpu.vector_store %arg9[%c1_106, %c0_107, %c28_108], %176 {strides = array<i32>} : memref<4x8x128xbf16, #tpu.memory_space<vmem>>, vector<1x8x72xbf16>,
    %177 = vector.extract_strided_slice %88 {offsets = [16, 0], sizes = [8, 72], strides = [1, 1]} : vector<32x72xf32> to vector<8x72xf32>
    %cst_109 = arith.constant 0.000000e+00 : f32
    %178 = vector.broadcast %cst_109 : f32 to vector<8x72xf32>
    %179 = arith.maximumf %177, %178 : vector<8x72xf32>
    %cst_110 = arith.constant 0.000000e+00 : f32
    %180 = vector.broadcast %cst_110 : f32 to vector<8x72xf32>
    %181 = arith.minimumf %177, %180 : vector<8x72xf32>
    %182 = math.exp %181 : vector<8x72xf32>
    %cst_111 = arith.constant 1.000000e+00 : f32
    %183 = vector.broadcast %cst_111 : f32 to vector<8x72xf32>
    %184 = arith.subf %182, %183 : vector<8x72xf32>
    %cst_112 = arith.constant 1.67326319 : f32
    %185 = vector.broadcast %cst_112 : f32 to vector<8x72xf32>
    %186 = arith.mulf %185, %184 : vector<8x72xf32>
    %187 = arith.addf %179, %186 : vector<8x72xf32>
    %cst_113 = arith.constant 1.05070102 : f32
    %188 = vector.broadcast %cst_113 : f32 to vector<8x72xf32>
    %189 = arith.mulf %188, %187 : vector<8x72xf32>
    %cst_114 = arith.constant dense<0.000000e+00> : vector<72xf32>
    %190 = vector.multi_reduction <add>, %189, %cst_114 [0] : vector<8x72xf32> to vector<72xf32>
    %191 = vector.shape_cast %190 : vector<72xf32> to vector<1x72xf32>
    %cst_115 = arith.constant 8.000000e+00 : f32
    %192 = vector.broadcast %cst_115 : f32 to vector<1x72xf32>
    %193 = arith.divf %191, %192 : vector<1x72xf32>
    %194 = vector.broadcast %193 : vector<1x72xf32> to vector<8x72xf32>
    %195 = arith.subf %189, %194 : vector<8x72xf32>
    %196 = arith.mulf %195, %195 : vector<8x72xf32>
    %cst_116 = arith.constant dense<0.000000e+00> : vector<72xf32>
    %197 = vector.multi_reduction <add>, %196, %cst_116 [0] : vector<8x72xf32> to vector<72xf32>
    %198 = vector.shape_cast %197 : vector<72xf32> to vector<1x72xf32>
    %cst_117 = arith.constant 7.000000e+00 : f32
    %199 = vector.broadcast %cst_117 : f32 to vector<1x72xf32>
    %200 = arith.divf %198, %199 : vector<1x72xf32>
    %201 = math.sqrt %200 : vector<1x72xf32>
    %cst_118 = arith.constant 9.99999971E-10 : f32
    %202 = vector.broadcast %cst_118 : f32 to vector<1x72xf32>
    %203 = arith.addf %201, %202 : vector<1x72xf32>
    %204 = tpu.reciprocal %203 {approx = true} : vector<1x72xf32> -> vector<1x72xf32>
    %205 = vector.broadcast %193 : vector<1x72xf32> to vector<8x72xf32>
    %206 = arith.subf %189, %205 : vector<8x72xf32>
    %207 = vector.broadcast %204 : vector<1x72xf32> to vector<8x72xf32>
    %208 = arith.mulf %206, %207 : vector<8x72xf32>
    %c0_119 = arith.constant 0 : index
    %c0_120 = arith.constant 0 : index
    %209 = vector.load %arg4[%c0_119, %c0_120] : memref<8x1xf32, #tpu.memory_space<vmem>>, vector<8x1xf32>
    %210 = vector.broadcast %209 : vector<8x1xf32> to vector<8x72xf32>
    %211 = arith.mulf %208, %210 : vector<8x72xf32>
    %c0_121 = arith.constant 0 : index
    %c0_122 = arith.constant 0 : index
    %212 = vector.load %arg5[%c0_121, %c0_122] : memref<8x1xf32, #tpu.memory_space<vmem>>, vector<8x1xf32>
    %213 = vector.broadcast %212 : vector<8x1xf32> to vector<8x72xf32>
    %214 = arith.addf %211, %213 : vector<8x72xf32>
    %215 = vector.broadcast %0 : vector<1x72xf32> to vector<8x72xf32>
    %216 = arith.mulf %214, %215 : vector<8x72xf32>
    %217 = arith.truncf %216 : vector<8x72xf32> to vector<8x72xbf16>
    %c2_123 = arith.constant 2 : index
    %c0_124 = arith.constant 0 : index
    %c28_125 = arith.constant 28 : index
    %218 = vector.load %arg9[%c2_123, %c0_124, %c28_125] : memref<4x8x128xbf16, #tpu.memory_space<vmem>>, vector<1x8x72xbf16>
    %219 = vector.shape_cast %218 : vector<1x8x72xbf16> to vector<8x72xbf16>
    %220 = vector.shape_cast %217 : vector<8x72xbf16> to vector<1x8x72xbf16>
    tpu.vector_store %arg9[%c2_123, %c0_124, %c28_125], %220 {strides = array<i32>} : memref<4x8x128xbf16, #tpu.memory_space<vmem>>, vector<1x8x72xbf16>,
    %221 = vector.extract_strided_slice %88 {offsets = [24, 0], sizes = [8, 72], strides = [1, 1]} : vector<32x72xf32> to vector<8x72xf32>
    %cst_126 = arith.constant 0.000000e+00 : f32
    %222 = vector.broadcast %cst_126 : f32 to vector<8x72xf32>
    %223 = arith.maximumf %221, %222 : vector<8x72xf32>
    %cst_127 = arith.constant 0.000000e+00 : f32
    %224 = vector.broadcast %cst_127 : f32 to vector<8x72xf32>
    %225 = arith.minimumf %221, %224 : vector<8x72xf32>
    %226 = math.exp %225 : vector<8x72xf32>
    %cst_128 = arith.constant 1.000000e+00 : f32
    %227 = vector.broadcast %cst_128 : f32 to vector<8x72xf32>
    %228 = arith.subf %226, %227 : vector<8x72xf32>
    %cst_129 = arith.constant 1.67326319 : f32
    %229 = vector.broadcast %cst_129 : f32 to vector<8x72xf32>
    %230 = arith.mulf %229, %228 : vector<8x72xf32>
    %231 = arith.addf %223, %230 : vector<8x72xf32>
    %cst_130 = arith.constant 1.05070102 : f32
    %232 = vector.broadcast %cst_130 : f32 to vector<8x72xf32>
    %233 = arith.mulf %232, %231 : vector<8x72xf32>
    %cst_131 = arith.constant dense<0.000000e+00> : vector<72xf32>
    %234 = vector.multi_reduction <add>, %233, %cst_131 [0] : vector<8x72xf32> to vector<72xf32>
    %235 = vector.shape_cast %234 : vector<72xf32> to vector<1x72xf32>
    %cst_132 = arith.constant 8.000000e+00 : f32
    %236 = vector.broadcast %cst_132 : f32 to vector<1x72xf32>
    %237 = arith.divf %235, %236 : vector<1x72xf32>
    %238 = vector.broadcast %237 : vector<1x72xf32> to vector<8x72xf32>
    %239 = arith.subf %233, %238 : vector<8x72xf32>
    %240 = arith.mulf %239, %239 : vector<8x72xf32>
    %cst_133 = arith.constant dense<0.000000e+00> : vector<72xf32>
    %241 = vector.multi_reduction <add>, %240, %cst_133 [0] : vector<8x72xf32> to vector<72xf32>
    %242 = vector.shape_cast %241 : vector<72xf32> to vector<1x72xf32>
    %cst_134 = arith.constant 7.000000e+00 : f32
    %243 = vector.broadcast %cst_134 : f32 to vector<1x72xf32>
    %244 = arith.divf %242, %243 : vector<1x72xf32>
    %245 = math.sqrt %244 : vector<1x72xf32>
    %cst_135 = arith.constant 9.99999971E-10 : f32
    %246 = vector.broadcast %cst_135 : f32 to vector<1x72xf32>
    %247 = arith.addf %245, %246 : vector<1x72xf32>
    %248 = tpu.reciprocal %247 {approx = true} : vector<1x72xf32> -> vector<1x72xf32>
    %249 = vector.broadcast %237 : vector<1x72xf32> to vector<8x72xf32>
    %250 = arith.subf %233, %249 : vector<8x72xf32>
    %251 = vector.broadcast %248 : vector<1x72xf32> to vector<8x72xf32>
    %252 = arith.mulf %250, %251 : vector<8x72xf32>
    %c0_136 = arith.constant 0 : index
    %c0_137 = arith.constant 0 : index
    %253 = vector.load %arg4[%c0_136, %c0_137] : memref<8x1xf32, #tpu.memory_space<vmem>>, vector<8x1xf32>
    %254 = vector.broadcast %253 : vector<8x1xf32> to vector<8x72xf32>
    %255 = arith.mulf %252, %254 : vector<8x72xf32>
    %c0_138 = arith.constant 0 : index
    %c0_139 = arith.constant 0 : index
    %256 = vector.load %arg5[%c0_138, %c0_139] : memref<8x1xf32, #tpu.memory_space<vmem>>, vector<8x1xf32>
    %257 = vector.broadcast %256 : vector<8x1xf32> to vector<8x72xf32>
    %258 = arith.addf %255, %257 : vector<8x72xf32>
    %259 = vector.broadcast %0 : vector<1x72xf32> to vector<8x72xf32>
    %260 = arith.mulf %258, %259 : vector<8x72xf32>
    %261 = arith.truncf %260 : vector<8x72xf32> to vector<8x72xbf16>
    %c3_140 = arith.constant 3 : index
    %c0_141 = arith.constant 0 : index
    %c28_142 = arith.constant 28 : index
    %262 = vector.load %arg9[%c3_140, %c0_141, %c28_142] : memref<4x8x128xbf16, #tpu.memory_space<vmem>>, vector<1x8x72xbf16>
    %263 = vector.shape_cast %262 : vector<1x8x72xbf16> to vector<8x72xbf16>
    %264 = vector.shape_cast %261 : vector<8x72xbf16> to vector<1x8x72xbf16>
    tpu.vector_store %arg9[%c3_140, %c0_141, %c28_142], %264 {strides = array<i32>} : memref<4x8x128xbf16, #tpu.memory_space<vmem>>, vector<1x8x72xbf16>,
    %c3_143 = arith.constant 3 : index
    %c0_144 = arith.constant 0 : index
    %c28_145 = arith.constant 28 : index
    %265 = vector.load %arg9[%c3_143, %c0_144, %c28_145] : memref<4x8x128xbf16, #tpu.memory_space<vmem>>, vector<1x8x72xbf16>
    %266 = vector.shape_cast %265 : vector<1x8x72xbf16> to vector<8x72xbf16>
    %c0_146 = arith.constant 0 : index
    %c0_147 = arith.constant 0 : index
    %c0_148 = arith.constant 0 : index
    %267 = vector.load %arg6[%c0_146, %c0_147, %c0_148] : memref<9x32x8xbf16, #tpu.memory_space<vmem>>, vector<1x32x8xbf16>
    %268 = vector.shape_cast %267 : vector<1x32x8xbf16> to vector<32x8xbf16>
    %cst_149 = arith.constant dense<0.000000e+00> : vector<32x72xf32>
    %269 = tpu.matmul %268, %266, %cst_149 {dimension_numbers = #tpu.dot_dimension_numbers<[1], [0], [0], [1], [0, 0, 1, 1], [], []>} : vector<32x8xbf16>, vector<8x72xbf16>, vector<32x72xf32> -> vector<32x72xf32>
    %c2_150 = arith.constant 2 : index
    %c0_151 = arith.constant 0 : index
    %c28_152 = arith.constant 28 : index
    %270 = vector.load %arg9[%c2_150, %c0_151, %c28_152] : memref<4x8x128xbf16, #tpu.memory_space<vmem>>, vector<1x8x72xbf16>
    %271 = vector.shape_cast %270 : vector<1x8x72xbf16> to vector<8x72xbf16>
    %c1_153 = arith.constant 1 : index
    %c0_154 = arith.constant 0 : index
    %c0_155 = arith.constant 0 : index
    %272 = vector.load %arg6[%c1_153, %c0_154, %c0_155] : memref<9x32x8xbf16, #tpu.memory_space<vmem>>, vector<1x32x8xbf16>
    %273 = vector.shape_cast %272 : vector<1x32x8xbf16> to vector<32x8xbf16>
    %cst_156 = arith.constant dense<0.000000e+00> : vector<32x72xf32>
    %274 = tpu.matmul %273, %271, %cst_156 {dimension_numbers = #tpu.dot_dimension_numbers<[1], [0], [0], [1], [0, 0, 1, 1], [], []>} : vector<32x8xbf16>, vector<8x72xbf16>, vector<32x72xf32> -> vector<32x72xf32>
    %275 = arith.addf %269, %274 : vector<32x72xf32>
    %c3_157 = arith.constant 3 : index
    %c0_158 = arith.constant 0 : index
    %c27_159 = arith.constant 27 : index
    %276 = vector.load %arg9[%c3_157, %c0_158, %c27_159] : memref<4x8x128xbf16, #tpu.memory_space<vmem>>, vector<1x8x72xbf16>
    %277 = vector.shape_cast %276 : vector<1x8x72xbf16> to vector<8x72xbf16>
    %c2_160 = arith.constant 2 : index
    %c0_161 = arith.constant 0 : index
    %c0_162 = arith.constant 0 : index
    %278 = vector.load %arg6[%c2_160, %c0_161, %c0_162] : memref<9x32x8xbf16, #tpu.memory_space<vmem>>, vector<1x32x8xbf16>
    %279 = vector.shape_cast %278 : vector<1x32x8xbf16> to vector<32x8xbf16>
    %cst_163 = arith.constant dense<0.000000e+00> : vector<32x72xf32>
    %280 = tpu.matmul %279, %277, %cst_163 {dimension_numbers = #tpu.dot_dimension_numbers<[1], [0], [0], [1], [0, 0, 1, 1], [], []>} : vector<32x8xbf16>, vector<8x72xbf16>, vector<32x72xf32> -> vector<32x72xf32>
    %281 = arith.addf %275, %280 : vector<32x72xf32>
    %c1_164 = arith.constant 1 : index
    %c0_165 = arith.constant 0 : index
    %c28_166 = arith.constant 28 : index
    %282 = vector.load %arg9[%c1_164, %c0_165, %c28_166] : memref<4x8x128xbf16, #tpu.memory_space<vmem>>, vector<1x8x72xbf16>
    %283 = vector.shape_cast %282 : vector<1x8x72xbf16> to vector<8x72xbf16>
    %c3_167 = arith.constant 3 : index
    %c0_168 = arith.constant 0 : index
    %c0_169 = arith.constant 0 : index
    %284 = vector.load %arg6[%c3_167, %c0_168, %c0_169] : memref<9x32x8xbf16, #tpu.memory_space<vmem>>, vector<1x32x8xbf16>
    %285 = vector.shape_cast %284 : vector<1x32x8xbf16> to vector<32x8xbf16>
    %cst_170 = arith.constant dense<0.000000e+00> : vector<32x72xf32>
    %286 = tpu.matmul %285, %283, %cst_170 {dimension_numbers = #tpu.dot_dimension_numbers<[1], [0], [0], [1], [0, 0, 1, 1], [], []>} : vector<32x8xbf16>, vector<8x72xbf16>, vector<32x72xf32> -> vector<32x72xf32>
    %287 = arith.addf %281, %286 : vector<32x72xf32>
    %c0_171 = arith.constant 0 : index
    %c0_172 = arith.constant 0 : index
    %c28_173 = arith.constant 28 : index
    %288 = vector.load %arg9[%c0_171, %c0_172, %c28_173] : memref<4x8x128xbf16, #tpu.memory_space<vmem>>, vector<1x8x72xbf16>
    %289 = vector.shape_cast %288 : vector<1x8x72xbf16> to vector<8x72xbf16>
    %c4_174 = arith.constant 4 : index
    %c0_175 = arith.constant 0 : index
    %c0_176 = arith.constant 0 : index
    %290 = vector.load %arg6[%c4_174, %c0_175, %c0_176] : memref<9x32x8xbf16, #tpu.memory_space<vmem>>, vector<1x32x8xbf16>
    %291 = vector.shape_cast %290 : vector<1x32x8xbf16> to vector<32x8xbf16>
    %cst_177 = arith.constant dense<0.000000e+00> : vector<32x72xf32>
    %292 = tpu.matmul %291, %289, %cst_177 {dimension_numbers = #tpu.dot_dimension_numbers<[1], [0], [0], [1], [0, 0, 1, 1], [], []>} : vector<32x8xbf16>, vector<8x72xbf16>, vector<32x72xf32> -> vector<32x72xf32>
    %293 = arith.addf %287, %292 : vector<32x72xf32>
    %c1_178 = arith.constant 1 : index
    %c0_179 = arith.constant 0 : index
    %c27_180 = arith.constant 27 : index
    %294 = vector.load %arg9[%c1_178, %c0_179, %c27_180] : memref<4x8x128xbf16, #tpu.memory_space<vmem>>, vector<1x8x72xbf16>
    %295 = vector.shape_cast %294 : vector<1x8x72xbf16> to vector<8x72xbf16>
    %c5_181 = arith.constant 5 : index
    %c0_182 = arith.constant 0 : index
    %c0_183 = arith.constant 0 : index
    %296 = vector.load %arg6[%c5_181, %c0_182, %c0_183] : memref<9x32x8xbf16, #tpu.memory_space<vmem>>, vector<1x32x8xbf16>
    %297 = vector.shape_cast %296 : vector<1x32x8xbf16> to vector<32x8xbf16>
    %cst_184 = arith.constant dense<0.000000e+00> : vector<32x72xf32>
    %298 = tpu.matmul %297, %295, %cst_184 {dimension_numbers = #tpu.dot_dimension_numbers<[1], [0], [0], [1], [0, 0, 1, 1], [], []>} : vector<32x8xbf16>, vector<8x72xbf16>, vector<32x72xf32> -> vector<32x72xf32>
    %299 = arith.addf %293, %298 : vector<32x72xf32>
    %c3_185 = arith.constant 3 : index
    %c0_186 = arith.constant 0 : index
    %c22_187 = arith.constant 22 : index
    %300 = vector.load %arg9[%c3_185, %c0_186, %c22_187] : memref<4x8x128xbf16, #tpu.memory_space<vmem>>, vector<1x8x72xbf16>
    %301 = vector.shape_cast %300 : vector<1x8x72xbf16> to vector<8x72xbf16>
    %c6_188 = arith.constant 6 : index
    %c0_189 = arith.constant 0 : index
    %c0_190 = arith.constant 0 : index
    %302 = vector.load %arg6[%c6_188, %c0_189, %c0_190] : memref<9x32x8xbf16, #tpu.memory_space<vmem>>, vector<1x32x8xbf16>
    %303 = vector.shape_cast %302 : vector<1x32x8xbf16> to vector<32x8xbf16>
    %cst_191 = arith.constant dense<0.000000e+00> : vector<32x72xf32>
    %304 = tpu.matmul %303, %301, %cst_191 {dimension_numbers = #tpu.dot_dimension_numbers<[1], [0], [0], [1], [0, 0, 1, 1], [], []>} : vector<32x8xbf16>, vector<8x72xbf16>, vector<32x72xf32> -> vector<32x72xf32>
    %305 = arith.addf %299, %304 : vector<32x72xf32>
    %c2_192 = arith.constant 2 : index
    %c0_193 = arith.constant 0 : index
    %c22_194 = arith.constant 22 : index
    %306 = vector.load %arg9[%c2_192, %c0_193, %c22_194] : memref<4x8x128xbf16, #tpu.memory_space<vmem>>, vector<1x8x72xbf16>
    %307 = vector.shape_cast %306 : vector<1x8x72xbf16> to vector<8x72xbf16>
    %c7_195 = arith.constant 7 : index
    %c0_196 = arith.constant 0 : index
    %c0_197 = arith.constant 0 : index
    %308 = vector.load %arg6[%c7_195, %c0_196, %c0_197] : memref<9x32x8xbf16, #tpu.memory_space<vmem>>, vector<1x32x8xbf16>
    %309 = vector.shape_cast %308 : vector<1x32x8xbf16> to vector<32x8xbf16>
    %cst_198 = arith.constant dense<0.000000e+00> : vector<32x72xf32>
    %310 = tpu.matmul %309, %307, %cst_198 {dimension_numbers = #tpu.dot_dimension_numbers<[1], [0], [0], [1], [0, 0, 1, 1], [], []>} : vector<32x8xbf16>, vector<8x72xbf16>, vector<32x72xf32> -> vector<32x72xf32>
    %311 = arith.addf %305, %310 : vector<32x72xf32>
    %c3_199 = arith.constant 3 : index
    %c0_200 = arith.constant 0 : index
    %c21_201 = arith.constant 21 : index
    %312 = vector.load %arg9[%c3_199, %c0_200, %c21_201] : memref<4x8x128xbf16, #tpu.memory_space<vmem>>, vector<1x8x72xbf16>
    %313 = vector.shape_cast %312 : vector<1x8x72xbf16> to vector<8x72xbf16>
    %c8_202 = arith.constant 8 : index
    %c0_203 = arith.constant 0 : index
    %c0_204 = arith.constant 0 : index
    %314 = vector.load %arg6[%c8_202, %c0_203, %c0_204] : memref<9x32x8xbf16, #tpu.memory_space<vmem>>, vector<1x32x8xbf16>
    %315 = vector.shape_cast %314 : vector<1x32x8xbf16> to vector<32x8xbf16>
    %cst_205 = arith.constant dense<0.000000e+00> : vector<32x72xf32>
    %316 = tpu.matmul %315, %313, %cst_205 {dimension_numbers = #tpu.dot_dimension_numbers<[1], [0], [0], [1], [0, 0, 1, 1], [], []>} : vector<32x8xbf16>, vector<8x72xbf16>, vector<32x72xf32> -> vector<32x72xf32>
    %317 = arith.addf %311, %316 : vector<32x72xf32>
    %318 = math.tanh %317 : vector<32x72xf32>
    %c0_206 = arith.constant 0 : index
    %c28_207 = arith.constant 28 : index
    %319 = vector.load %arg7[%c0_206, %c28_207] : memref<128x128xf32, #tpu.memory_space<vmem>>, vector<32x72xf32>
    tpu.vector_store %arg7[%c0_206, %c28_207], %318 {strides = array<i32>} : memref<128x128xf32, #tpu.memory_space<vmem>>, vector<32x72xf32>,
    %c2_208 = arith.constant 2 : index
    %c0_209 = arith.constant 0 : index
    %c29_210 = arith.constant 29 : index
    %320 = vector.load %arg9[%c2_208, %c0_209, %c29_210] : memref<4x8x128xbf16, #tpu.memory_space<vmem>>, vector<1x8x72xbf16>
    %321 = vector.shape_cast %320 : vector<1x8x72xbf16> to vector<8x72xbf16>
    %c0_211 = arith.constant 0 : index
    %c0_212 = arith.constant 0 : index
    %c0_213 = arith.constant 0 : index
    %322 = vector.load %arg6[%c0_211, %c0_212, %c0_213] : memref<9x32x8xbf16, #tpu.memory_space<vmem>>, vector<1x32x8xbf16>
    %323 = vector.shape_cast %322 : vector<1x32x8xbf16> to vector<32x8xbf16>
    %cst_214 = arith.constant dense<0.000000e+00> : vector<32x72xf32>
    %324 = tpu.matmul %323, %321, %cst_214 {dimension_numbers = #tpu.dot_dimension_numbers<[1], [0], [0], [1], [0, 0, 1, 1], [], []>} : vector<32x8xbf16>, vector<8x72xbf16>, vector<32x72xf32> -> vector<32x72xf32>
    %c3_215 = arith.constant 3 : index
    %c0_216 = arith.constant 0 : index
    %c28_217 = arith.constant 28 : index
    %325 = vector.load %arg9[%c3_215, %c0_216, %c28_217] : memref<4x8x128xbf16, #tpu.memory_space<vmem>>, vector<1x8x72xbf16>
    %326 = vector.shape_cast %325 : vector<1x8x72xbf16> to vector<8x72xbf16>
    %c1_218 = arith.constant 1 : index
    %c0_219 = arith.constant 0 : index
    %c0_220 = arith.constant 0 : index
    %327 = vector.load %arg6[%c1_218, %c0_219, %c0_220] : memref<9x32x8xbf16, #tpu.memory_space<vmem>>, vector<1x32x8xbf16>
    %328 = vector.shape_cast %327 : vector<1x32x8xbf16> to vector<32x8xbf16>
    %cst_221 = arith.constant dense<0.000000e+00> : vector<32x72xf32>
    %329 = tpu.matmul %328, %326, %cst_221 {dimension_numbers = #tpu.dot_dimension_numbers<[1], [0], [0], [1], [0, 0, 1, 1], [], []>} : vector<32x8xbf16>, vector<8x72xbf16>, vector<32x72xf32> -> vector<32x72xf32>
    %330 = arith.addf %324, %329 : vector<32x72xf32>
    %c2_222 = arith.constant 2 : index
    %c0_223 = arith.constant 0 : index
    %c28_224 = arith.constant 28 : index
    %331 = vector.load %arg9[%c2_222, %c0_223, %c28_224] : memref<4x8x128xbf16, #tpu.memory_space<vmem>>, vector<1x8x72xbf16>
    %332 = vector.shape_cast %331 : vector<1x8x72xbf16> to vector<8x72xbf16>
    %c2_225 = arith.constant 2 : index
    %c0_226 = arith.constant 0 : index
    %c0_227 = arith.constant 0 : index
    %333 = vector.load %arg6[%c2_225, %c0_226, %c0_227] : memref<9x32x8xbf16, #tpu.memory_space<vmem>>, vector<1x32x8xbf16>
    %334 = vector.shape_cast %333 : vector<1x32x8xbf16> to vector<32x8xbf16>
    %cst_228 = arith.constant dense<0.000000e+00> : vector<32x72xf32>
    %335 = tpu.matmul %334, %332, %cst_228 {dimension_numbers = #tpu.dot_dimension_numbers<[1], [0], [0], [1], [0, 0, 1, 1], [], []>} : vector<32x8xbf16>, vector<8x72xbf16>, vector<32x72xf32> -> vector<32x72xf32>
    %336 = arith.addf %330, %335 : vector<32x72xf32>
    %c0_229 = arith.constant 0 : index
    %c0_230 = arith.constant 0 : index
    %c29_231 = arith.constant 29 : index
    %337 = vector.load %arg9[%c0_229, %c0_230, %c29_231] : memref<4x8x128xbf16, #tpu.memory_space<vmem>>, vector<1x8x72xbf16>
    %338 = vector.shape_cast %337 : vector<1x8x72xbf16> to vector<8x72xbf16>
    %c3_232 = arith.constant 3 : index
    %c0_233 = arith.constant 0 : index
    %c0_234 = arith.constant 0 : index
    %339 = vector.load %arg6[%c3_232, %c0_233, %c0_234] : memref<9x32x8xbf16, #tpu.memory_space<vmem>>, vector<1x32x8xbf16>
    %340 = vector.shape_cast %339 : vector<1x32x8xbf16> to vector<32x8xbf16>
    %cst_235 = arith.constant dense<0.000000e+00> : vector<32x72xf32>
    %341 = tpu.matmul %340, %338, %cst_235 {dimension_numbers = #tpu.dot_dimension_numbers<[1], [0], [0], [1], [0, 0, 1, 1], [], []>} : vector<32x8xbf16>, vector<8x72xbf16>, vector<32x72xf32> -> vector<32x72xf32>
    %342 = arith.addf %336, %341 : vector<32x72xf32>
    %c1_236 = arith.constant 1 : index
    %c0_237 = arith.constant 0 : index
    %c28_238 = arith.constant 28 : index
    %343 = vector.load %arg9[%c1_236, %c0_237, %c28_238] : memref<4x8x128xbf16, #tpu.memory_space<vmem>>, vector<1x8x72xbf16>
    %344 = vector.shape_cast %343 : vector<1x8x72xbf16> to vector<8x72xbf16>
    %c4_239 = arith.constant 4 : index
    %c0_240 = arith.constant 0 : index
    %c0_241 = arith.constant 0 : index
    %345 = vector.load %arg6[%c4_239, %c0_240, %c0_241] : memref<9x32x8xbf16, #tpu.memory_space<vmem>>, vector<1x32x8xbf16>
    %346 = vector.shape_cast %345 : vector<1x32x8xbf16> to vector<32x8xbf16>
    %cst_242 = arith.constant dense<0.000000e+00> : vector<32x72xf32>
    %347 = tpu.matmul %346, %344, %cst_242 {dimension_numbers = #tpu.dot_dimension_numbers<[1], [0], [0], [1], [0, 0, 1, 1], [], []>} : vector<32x8xbf16>, vector<8x72xbf16>, vector<32x72xf32> -> vector<32x72xf32>
    %348 = arith.addf %342, %347 : vector<32x72xf32>
    %c0_243 = arith.constant 0 : index
    %c0_244 = arith.constant 0 : index
    %c28_245 = arith.constant 28 : index
    %349 = vector.load %arg9[%c0_243, %c0_244, %c28_245] : memref<4x8x128xbf16, #tpu.memory_space<vmem>>, vector<1x8x72xbf16>
    %350 = vector.shape_cast %349 : vector<1x8x72xbf16> to vector<8x72xbf16>
    %c5_246 = arith.constant 5 : index
    %c0_247 = arith.constant 0 : index
    %c0_248 = arith.constant 0 : index
    %351 = vector.load %arg6[%c5_246, %c0_247, %c0_248] : memref<9x32x8xbf16, #tpu.memory_space<vmem>>, vector<1x32x8xbf16>
    %352 = vector.shape_cast %351 : vector<1x32x8xbf16> to vector<32x8xbf16>
    %cst_249 = arith.constant dense<0.000000e+00> : vector<32x72xf32>
    %353 = tpu.matmul %352, %350, %cst_249 {dimension_numbers = #tpu.dot_dimension_numbers<[1], [0], [0], [1], [0, 0, 1, 1], [], []>} : vector<32x8xbf16>, vector<8x72xbf16>, vector<32x72xf32> -> vector<32x72xf32>
    %354 = arith.addf %348, %353 : vector<32x72xf32>
    %c2_250 = arith.constant 2 : index
    %c0_251 = arith.constant 0 : index
    %c23_252 = arith.constant 23 : index
    %355 = vector.load %arg9[%c2_250, %c0_251, %c23_252] : memref<4x8x128xbf16, #tpu.memory_space<vmem>>, vector<1x8x72xbf16>
    %356 = vector.shape_cast %355 : vector<1x8x72xbf16> to vector<8x72xbf16>
    %c6_253 = arith.constant 6 : index
    %c0_254 = arith.constant 0 : index
    %c0_255 = arith.constant 0 : index
    %357 = vector.load %arg6[%c6_253, %c0_254, %c0_255] : memref<9x32x8xbf16, #tpu.memory_space<vmem>>, vector<1x32x8xbf16>
    %358 = vector.shape_cast %357 : vector<1x32x8xbf16> to vector<32x8xbf16>
    %cst_256 = arith.constant dense<0.000000e+00> : vector<32x72xf32>
    %359 = tpu.matmul %358, %356, %cst_256 {dimension_numbers = #tpu.dot_dimension_numbers<[1], [0], [0], [1], [0, 0, 1, 1], [], []>} : vector<32x8xbf16>, vector<8x72xbf16>, vector<32x72xf32> -> vector<32x72xf32>
    %360 = arith.addf %354, %359 : vector<32x72xf32>
    %c3_257 = arith.constant 3 : index
    %c0_258 = arith.constant 0 : index
    %c22_259 = arith.constant 22 : index
    %361 = vector.load %arg9[%c3_257, %c0_258, %c22_259] : memref<4x8x128xbf16, #tpu.memory_space<vmem>>, vector<1x8x72xbf16>
    %362 = vector.shape_cast %361 : vector<1x8x72xbf16> to vector<8x72xbf16>
    %c7_260 = arith.constant 7 : index
    %c0_261 = arith.constant 0 : index
    %c0_262 = arith.constant 0 : index
    %363 = vector.load %arg6[%c7_260, %c0_261, %c0_262] : memref<9x32x8xbf16, #tpu.memory_space<vmem>>, vector<1x32x8xbf16>
    %364 = vector.shape_cast %363 : vector<1x32x8xbf16> to vector<32x8xbf16>
    %cst_263 = arith.constant dense<0.000000e+00> : vector<32x72xf32>
    %365 = tpu.matmul %364, %362, %cst_263 {dimension_numbers = #tpu.dot_dimension_numbers<[1], [0], [0], [1], [0, 0, 1, 1], [], []>} : vector<32x8xbf16>, vector<8x72xbf16>, vector<32x72xf32> -> vector<32x72xf32>
    %366 = arith.addf %360, %365 : vector<32x72xf32>
    %c2_264 = arith.constant 2 : index
    %c0_265 = arith.constant 0 : index
    %c22_266 = arith.constant 22 : index
    %367 = vector.load %arg9[%c2_264, %c0_265, %c22_266] : memref<4x8x128xbf16, #tpu.memory_space<vmem>>, vector<1x8x72xbf16>
    %368 = vector.shape_cast %367 : vector<1x8x72xbf16> to vector<8x72xbf16>
    %c8_267 = arith.constant 8 : index
    %c0_268 = arith.constant 0 : index
    %c0_269 = arith.constant 0 : index
    %369 = vector.load %arg6[%c8_267, %c0_268, %c0_269] : memref<9x32x8xbf16, #tpu.memory_space<vmem>>, vector<1x32x8xbf16>
    %370 = vector.shape_cast %369 : vector<1x32x8xbf16> to vector<32x8xbf16>
    %cst_270 = arith.constant dense<0.000000e+00> : vector<32x72xf32>
    %371 = tpu.matmul %370, %368, %cst_270 {dimension_numbers = #tpu.dot_dimension_numbers<[1], [0], [0], [1], [0, 0, 1, 1], [], []>} : vector<32x8xbf16>, vector<8x72xbf16>, vector<32x72xf32> -> vector<32x72xf32>
    %372 = arith.addf %366, %371 : vector<32x72xf32>
    %373 = math.tanh %372 : vector<32x72xf32>
    %c32 = arith.constant 32 : index
    %c28_271 = arith.constant 28 : index
    %374 = vector.load %arg7[%c32, %c28_271] : memref<128x128xf32, #tpu.memory_space<vmem>>, vector<32x72xf32>
    tpu.vector_store %arg7[%c32, %c28_271], %373 {strides = array<i32>} : memref<128x128xf32, #tpu.memory_space<vmem>>, vector<32x72xf32>,
    %c1_272 = arith.constant 1 : index
    %c0_273 = arith.constant 0 : index
    %c34_274 = arith.constant 34 : index
    %375 = vector.load %arg9[%c1_272, %c0_273, %c34_274] : memref<4x8x128xbf16, #tpu.memory_space<vmem>>, vector<1x8x72xbf16>
    %376 = vector.shape_cast %375 : vector<1x8x72xbf16> to vector<8x72xbf16>
    %c0_275 = arith.constant 0 : index
    %c0_276 = arith.constant 0 : index
    %c0_277 = arith.constant 0 : index
    %377 = vector.load %arg6[%c0_275, %c0_276, %c0_277] : memref<9x32x8xbf16, #tpu.memory_space<vmem>>, vector<1x32x8xbf16>
    %378 = vector.shape_cast %377 : vector<1x32x8xbf16> to vector<32x8xbf16>
    %cst_278 = arith.constant dense<0.000000e+00> : vector<32x72xf32>
    %379 = tpu.matmul %378, %376, %cst_278 {dimension_numbers = #tpu.dot_dimension_numbers<[1], [0], [0], [1], [0, 0, 1, 1], [], []>} : vector<32x8xbf16>, vector<8x72xbf16>, vector<32x72xf32> -> vector<32x72xf32>
    %c0_279 = arith.constant 0 : index
    %c0_280 = arith.constant 0 : index
    %c34_281 = arith.constant 34 : index
    %380 = vector.load %arg9[%c0_279, %c0_280, %c34_281] : memref<4x8x128xbf16, #tpu.memory_space<vmem>>, vector<1x8x72xbf16>
    %381 = vector.shape_cast %380 : vector<1x8x72xbf16> to vector<8x72xbf16>
    %c1_282 = arith.constant 1 : index
    %c0_283 = arith.constant 0 : index
    %c0_284 = arith.constant 0 : index
    %382 = vector.load %arg6[%c1_282, %c0_283, %c0_284] : memref<9x32x8xbf16, #tpu.memory_space<vmem>>, vector<1x32x8xbf16>
    %383 = vector.shape_cast %382 : vector<1x32x8xbf16> to vector<32x8xbf16>
    %cst_285 = arith.constant dense<0.000000e+00> : vector<32x72xf32>
    %384 = tpu.matmul %383, %381, %cst_285 {dimension_numbers = #tpu.dot_dimension_numbers<[1], [0], [0], [1], [0, 0, 1, 1], [], []>} : vector<32x8xbf16>, vector<8x72xbf16>, vector<32x72xf32> -> vector<32x72xf32>
    %385 = arith.addf %379, %384 : vector<32x72xf32>
    %c1_286 = arith.constant 1 : index
    %c0_287 = arith.constant 0 : index
    %c33_288 = arith.constant 33 : index
    %386 = vector.load %arg9[%c1_286, %c0_287, %c33_288] : memref<4x8x128xbf16, #tpu.memory_space<vmem>>, vector<1x8x72xbf16>
    %387 = vector.shape_cast %386 : vector<1x8x72xbf16> to vector<8x72xbf16>
    %c2_289 = arith.constant 2 : index
    %c0_290 = arith.constant 0 : index
    %c0_291 = arith.constant 0 : index
    %388 = vector.load %arg6[%c2_289, %c0_290, %c0_291] : memref<9x32x8xbf16, #tpu.memory_space<vmem>>, vector<1x32x8xbf16>
    %389 = vector.shape_cast %388 : vector<1x32x8xbf16> to vector<32x8xbf16>
    %cst_292 = arith.constant dense<0.000000e+00> : vector<32x72xf32>
    %390 = tpu.matmul %389, %387, %cst_292 {dimension_numbers = #tpu.dot_dimension_numbers<[1], [0], [0], [1], [0, 0, 1, 1], [], []>} : vector<32x8xbf16>, vector<8x72xbf16>, vector<32x72xf32> -> vector<32x72xf32>
    %391 = arith.addf %385, %390 : vector<32x72xf32>
    %c3_293 = arith.constant 3 : index
    %c0_294 = arith.constant 0 : index
    %c28_295 = arith.constant 28 : index
    %392 = vector.load %arg9[%c3_293, %c0_294, %c28_295] : memref<4x8x128xbf16, #tpu.memory_space<vmem>>, vector<1x8x72xbf16>
    %393 = vector.shape_cast %392 : vector<1x8x72xbf16> to vector<8x72xbf16>
    %c3_296 = arith.constant 3 : index
    %c0_297 = arith.constant 0 : index
    %c0_298 = arith.constant 0 : index
    %394 = vector.load %arg6[%c3_296, %c0_297, %c0_298] : memref<9x32x8xbf16, #tpu.memory_space<vmem>>, vector<1x32x8xbf16>
    %395 = vector.shape_cast %394 : vector<1x32x8xbf16> to vector<32x8xbf16>
    %cst_299 = arith.constant dense<0.000000e+00> : vector<32x72xf32>
    %396 = tpu.matmul %395, %393, %cst_299 {dimension_numbers = #tpu.dot_dimension_numbers<[1], [0], [0], [1], [0, 0, 1, 1], [], []>} : vector<32x8xbf16>, vector<8x72xbf16>, vector<32x72xf32> -> vector<32x72xf32>
    %397 = arith.addf %391, %396 : vector<32x72xf32>
    %c2_300 = arith.constant 2 : index
    %c0_301 = arith.constant 0 : index
    %c28_302 = arith.constant 28 : index
    %398 = vector.load %arg9[%c2_300, %c0_301, %c28_302] : memref<4x8x128xbf16, #tpu.memory_space<vmem>>, vector<1x8x72xbf16>
    %399 = vector.shape_cast %398 : vector<1x8x72xbf16> to vector<8x72xbf16>
    %c4_303 = arith.constant 4 : index
    %c0_304 = arith.constant 0 : index
    %c0_305 = arith.constant 0 : index
    %400 = vector.load %arg6[%c4_303, %c0_304, %c0_305] : memref<9x32x8xbf16, #tpu.memory_space<vmem>>, vector<1x32x8xbf16>
    %401 = vector.shape_cast %400 : vector<1x32x8xbf16> to vector<32x8xbf16>
    %cst_306 = arith.constant dense<0.000000e+00> : vector<32x72xf32>
    %402 = tpu.matmul %401, %399, %cst_306 {dimension_numbers = #tpu.dot_dimension_numbers<[1], [0], [0], [1], [0, 0, 1, 1], [], []>} : vector<32x8xbf16>, vector<8x72xbf16>, vector<32x72xf32> -> vector<32x72xf32>
    %403 = arith.addf %397, %402 : vector<32x72xf32>
    %c3_307 = arith.constant 3 : index
    %c0_308 = arith.constant 0 : index
    %c27_309 = arith.constant 27 : index
    %404 = vector.load %arg9[%c3_307, %c0_308, %c27_309] : memref<4x8x128xbf16, #tpu.memory_space<vmem>>, vector<1x8x72xbf16>
    %405 = vector.shape_cast %404 : vector<1x8x72xbf16> to vector<8x72xbf16>
    %c5_310 = arith.constant 5 : index
    %c0_311 = arith.constant 0 : index
    %c0_312 = arith.constant 0 : index
    %406 = vector.load %arg6[%c5_310, %c0_311, %c0_312] : memref<9x32x8xbf16, #tpu.memory_space<vmem>>, vector<1x32x8xbf16>
    %407 = vector.shape_cast %406 : vector<1x32x8xbf16> to vector<32x8xbf16>
    %cst_313 = arith.constant dense<0.000000e+00> : vector<32x72xf32>
    %408 = tpu.matmul %407, %405, %cst_313 {dimension_numbers = #tpu.dot_dimension_numbers<[1], [0], [0], [1], [0, 0, 1, 1], [], []>} : vector<32x8xbf16>, vector<8x72xbf16>, vector<32x72xf32> -> vector<32x72xf32>
    %409 = arith.addf %403, %408 : vector<32x72xf32>
    %c1_314 = arith.constant 1 : index
    %c0_315 = arith.constant 0 : index
    %c28_316 = arith.constant 28 : index
    %410 = vector.load %arg9[%c1_314, %c0_315, %c28_316] : memref<4x8x128xbf16, #tpu.memory_space<vmem>>, vector<1x8x72xbf16>
    %411 = vector.shape_cast %410 : vector<1x8x72xbf16> to vector<8x72xbf16>
    %c6_317 = arith.constant 6 : index
    %c0_318 = arith.constant 0 : index
    %c0_319 = arith.constant 0 : index
    %412 = vector.load %arg6[%c6_317, %c0_318, %c0_319] : memref<9x32x8xbf16, #tpu.memory_space<vmem>>, vector<1x32x8xbf16>
    %413 = vector.shape_cast %412 : vector<1x32x8xbf16> to vector<32x8xbf16>
    %cst_320 = arith.constant dense<0.000000e+00> : vector<32x72xf32>
    %414 = tpu.matmul %413, %411, %cst_320 {dimension_numbers = #tpu.dot_dimension_numbers<[1], [0], [0], [1], [0, 0, 1, 1], [], []>} : vector<32x8xbf16>, vector<8x72xbf16>, vector<32x72xf32> -> vector<32x72xf32>
    %415 = arith.addf %409, %414 : vector<32x72xf32>
    %c0_321 = arith.constant 0 : index
    %c0_322 = arith.constant 0 : index
    %c28_323 = arith.constant 28 : index
    %416 = vector.load %arg9[%c0_321, %c0_322, %c28_323] : memref<4x8x128xbf16, #tpu.memory_space<vmem>>, vector<1x8x72xbf16>
    %417 = vector.shape_cast %416 : vector<1x8x72xbf16> to vector<8x72xbf16>
    %c7_324 = arith.constant 7 : index
    %c0_325 = arith.constant 0 : index
    %c0_326 = arith.constant 0 : index
    %418 = vector.load %arg6[%c7_324, %c0_325, %c0_326] : memref<9x32x8xbf16, #tpu.memory_space<vmem>>, vector<1x32x8xbf16>
    %419 = vector.shape_cast %418 : vector<1x32x8xbf16> to vector<32x8xbf16>
    %cst_327 = arith.constant dense<0.000000e+00> : vector<32x72xf32>
    %420 = tpu.matmul %419, %417, %cst_327 {dimension_numbers = #tpu.dot_dimension_numbers<[1], [0], [0], [1], [0, 0, 1, 1], [], []>} : vector<32x8xbf16>, vector<8x72xbf16>, vector<32x72xf32> -> vector<32x72xf32>
    %421 = arith.addf %415, %420 : vector<32x72xf32>
    %c1_328 = arith.constant 1 : index
    %c0_329 = arith.constant 0 : index
    %c27_330 = arith.constant 27 : index
    %422 = vector.load %arg9[%c1_328, %c0_329, %c27_330] : memref<4x8x128xbf16, #tpu.memory_space<vmem>>, vector<1x8x72xbf16>
    %423 = vector.shape_cast %422 : vector<1x8x72xbf16> to vector<8x72xbf16>
    %c8_331 = arith.constant 8 : index
    %c0_332 = arith.constant 0 : index
    %c0_333 = arith.constant 0 : index
    %424 = vector.load %arg6[%c8_331, %c0_332, %c0_333] : memref<9x32x8xbf16, #tpu.memory_space<vmem>>, vector<1x32x8xbf16>
    %425 = vector.shape_cast %424 : vector<1x32x8xbf16> to vector<32x8xbf16>
    %cst_334 = arith.constant dense<0.000000e+00> : vector<32x72xf32>
    %426 = tpu.matmul %425, %423, %cst_334 {dimension_numbers = #tpu.dot_dimension_numbers<[1], [0], [0], [1], [0, 0, 1, 1], [], []>} : vector<32x8xbf16>, vector<8x72xbf16>, vector<32x72xf32> -> vector<32x72xf32>
    %427 = arith.addf %421, %426 : vector<32x72xf32>
    %428 = math.tanh %427 : vector<32x72xf32>
    %c64 = arith.constant 64 : index
    %c28_335 = arith.constant 28 : index
    %429 = vector.load %arg7[%c64, %c28_335] : memref<128x128xf32, #tpu.memory_space<vmem>>, vector<32x72xf32>
    tpu.vector_store %arg7[%c64, %c28_335], %428 {strides = array<i32>} : memref<128x128xf32, #tpu.memory_space<vmem>>, vector<32x72xf32>,
    %c0_336 = arith.constant 0 : index
    %c0_337 = arith.constant 0 : index
    %c35_338 = arith.constant 35 : index
    %430 = vector.load %arg9[%c0_336, %c0_337, %c35_338] : memref<4x8x128xbf16, #tpu.memory_space<vmem>>, vector<1x8x72xbf16>
    %431 = vector.shape_cast %430 : vector<1x8x72xbf16> to vector<8x72xbf16>
    %c0_339 = arith.constant 0 : index
    %c0_340 = arith.constant 0 : index
    %c0_341 = arith.constant 0 : index
    %432 = vector.load %arg6[%c0_339, %c0_340, %c0_341] : memref<9x32x8xbf16, #tpu.memory_space<vmem>>, vector<1x32x8xbf16>
    %433 = vector.shape_cast %432 : vector<1x32x8xbf16> to vector<32x8xbf16>
    %cst_342 = arith.constant dense<0.000000e+00> : vector<32x72xf32>
    %434 = tpu.matmul %433, %431, %cst_342 {dimension_numbers = #tpu.dot_dimension_numbers<[1], [0], [0], [1], [0, 0, 1, 1], [], []>} : vector<32x8xbf16>, vector<8x72xbf16>, vector<32x72xf32> -> vector<32x72xf32>
    %c1_343 = arith.constant 1 : index
    %c0_344 = arith.constant 0 : index
    %c34_345 = arith.constant 34 : index
    %435 = vector.load %arg9[%c1_343, %c0_344, %c34_345] : memref<4x8x128xbf16, #tpu.memory_space<vmem>>, vector<1x8x72xbf16>
    %436 = vector.shape_cast %435 : vector<1x8x72xbf16> to vector<8x72xbf16>
    %c1_346 = arith.constant 1 : index
    %c0_347 = arith.constant 0 : index
    %c0_348 = arith.constant 0 : index
    %437 = vector.load %arg6[%c1_346, %c0_347, %c0_348] : memref<9x32x8xbf16, #tpu.memory_space<vmem>>, vector<1x32x8xbf16>
    %438 = vector.shape_cast %437 : vector<1x32x8xbf16> to vector<32x8xbf16>
    %cst_349 = arith.constant dense<0.000000e+00> : vector<32x72xf32>
    %439 = tpu.matmul %438, %436, %cst_349 {dimension_numbers = #tpu.dot_dimension_numbers<[1], [0], [0], [1], [0, 0, 1, 1], [], []>} : vector<32x8xbf16>, vector<8x72xbf16>, vector<32x72xf32> -> vector<32x72xf32>
    %440 = arith.addf %434, %439 : vector<32x72xf32>
    %c0_350 = arith.constant 0 : index
    %c0_351 = arith.constant 0 : index
    %c34_352 = arith.constant 34 : index
    %441 = vector.load %arg9[%c0_350, %c0_351, %c34_352] : memref<4x8x128xbf16, #tpu.memory_space<vmem>>, vector<1x8x72xbf16>
    %442 = vector.shape_cast %441 : vector<1x8x72xbf16> to vector<8x72xbf16>
    %c2_353 = arith.constant 2 : index
    %c0_354 = arith.constant 0 : index
    %c0_355 = arith.constant 0 : index
    %443 = vector.load %arg6[%c2_353, %c0_354, %c0_355] : memref<9x32x8xbf16, #tpu.memory_space<vmem>>, vector<1x32x8xbf16>
    %444 = vector.shape_cast %443 : vector<1x32x8xbf16> to vector<32x8xbf16>
    %cst_356 = arith.constant dense<0.000000e+00> : vector<32x72xf32>
    %445 = tpu.matmul %444, %442, %cst_356 {dimension_numbers = #tpu.dot_dimension_numbers<[1], [0], [0], [1], [0, 0, 1, 1], [], []>} : vector<32x8xbf16>, vector<8x72xbf16>, vector<32x72xf32> -> vector<32x72xf32>
    %446 = arith.addf %440, %445 : vector<32x72xf32>
    %c2_357 = arith.constant 2 : index
    %c0_358 = arith.constant 0 : index
    %c29_359 = arith.constant 29 : index
    %447 = vector.load %arg9[%c2_357, %c0_358, %c29_359] : memref<4x8x128xbf16, #tpu.memory_space<vmem>>, vector<1x8x72xbf16>
    %448 = vector.shape_cast %447 : vector<1x8x72xbf16> to vector<8x72xbf16>
    %c3_360 = arith.constant 3 : index
    %c0_361 = arith.constant 0 : index
    %c0_362 = arith.constant 0 : index
    %449 = vector.load %arg6[%c3_360, %c0_361, %c0_362] : memref<9x32x8xbf16, #tpu.memory_space<vmem>>, vector<1x32x8xbf16>
    %450 = vector.shape_cast %449 : vector<1x32x8xbf16> to vector<32x8xbf16>
    %cst_363 = arith.constant dense<0.000000e+00> : vector<32x72xf32>
    %451 = tpu.matmul %450, %448, %cst_363 {dimension_numbers = #tpu.dot_dimension_numbers<[1], [0], [0], [1], [0, 0, 1, 1], [], []>} : vector<32x8xbf16>, vector<8x72xbf16>, vector<32x72xf32> -> vector<32x72xf32>
    %452 = arith.addf %446, %451 : vector<32x72xf32>
    %c3_364 = arith.constant 3 : index
    %c0_365 = arith.constant 0 : index
    %c28_366 = arith.constant 28 : index
    %453 = vector.load %arg9[%c3_364, %c0_365, %c28_366] : memref<4x8x128xbf16, #tpu.memory_space<vmem>>, vector<1x8x72xbf16>
    %454 = vector.shape_cast %453 : vector<1x8x72xbf16> to vector<8x72xbf16>
    %c4_367 = arith.constant 4 : index
    %c0_368 = arith.constant 0 : index
    %c0_369 = arith.constant 0 : index
    %455 = vector.load %arg6[%c4_367, %c0_368, %c0_369] : memref<9x32x8xbf16, #tpu.memory_space<vmem>>, vector<1x32x8xbf16>
    %456 = vector.shape_cast %455 : vector<1x32x8xbf16> to vector<32x8xbf16>
    %cst_370 = arith.constant dense<0.000000e+00> : vector<32x72xf32>
    %457 = tpu.matmul %456, %454, %cst_370 {dimension_numbers = #tpu.dot_dimension_numbers<[1], [0], [0], [1], [0, 0, 1, 1], [], []>} : vector<32x8xbf16>, vector<8x72xbf16>, vector<32x72xf32> -> vector<32x72xf32>
    %458 = arith.addf %452, %457 : vector<32x72xf32>
    %c2_371 = arith.constant 2 : index
    %c0_372 = arith.constant 0 : index
    %c28_373 = arith.constant 28 : index
    %459 = vector.load %arg9[%c2_371, %c0_372, %c28_373] : memref<4x8x128xbf16, #tpu.memory_space<vmem>>, vector<1x8x72xbf16>
    %460 = vector.shape_cast %459 : vector<1x8x72xbf16> to vector<8x72xbf16>
    %c5_374 = arith.constant 5 : index
    %c0_375 = arith.constant 0 : index
    %c0_376 = arith.constant 0 : index
    %461 = vector.load %arg6[%c5_374, %c0_375, %c0_376] : memref<9x32x8xbf16, #tpu.memory_space<vmem>>, vector<1x32x8xbf16>
    %462 = vector.shape_cast %461 : vector<1x32x8xbf16> to vector<32x8xbf16>
    %cst_377 = arith.constant dense<0.000000e+00> : vector<32x72xf32>
    %463 = tpu.matmul %462, %460, %cst_377 {dimension_numbers = #tpu.dot_dimension_numbers<[1], [0], [0], [1], [0, 0, 1, 1], [], []>} : vector<32x8xbf16>, vector<8x72xbf16>, vector<32x72xf32> -> vector<32x72xf32>
    %464 = arith.addf %458, %463 : vector<32x72xf32>
    %c0_378 = arith.constant 0 : index
    %c0_379 = arith.constant 0 : index
    %c29_380 = arith.constant 29 : index
    %465 = vector.load %arg9[%c0_378, %c0_379, %c29_380] : memref<4x8x128xbf16, #tpu.memory_space<vmem>>, vector<1x8x72xbf16>
    %466 = vector.shape_cast %465 : vector<1x8x72xbf16> to vector<8x72xbf16>
    %c6_381 = arith.constant 6 : index
    %c0_382 = arith.constant 0 : index
    %c0_383 = arith.constant 0 : index
    %467 = vector.load %arg6[%c6_381, %c0_382, %c0_383] : memref<9x32x8xbf16, #tpu.memory_space<vmem>>, vector<1x32x8xbf16>
    %468 = vector.shape_cast %467 : vector<1x32x8xbf16> to vector<32x8xbf16>
    %cst_384 = arith.constant dense<0.000000e+00> : vector<32x72xf32>
    %469 = tpu.matmul %468, %466, %cst_384 {dimension_numbers = #tpu.dot_dimension_numbers<[1], [0], [0], [1], [0, 0, 1, 1], [], []>} : vector<32x8xbf16>, vector<8x72xbf16>, vector<32x72xf32> -> vector<32x72xf32>
    %470 = arith.addf %464, %469 : vector<32x72xf32>
    %c1_385 = arith.constant 1 : index
    %c0_386 = arith.constant 0 : index
    %c28_387 = arith.constant 28 : index
    %471 = vector.load %arg9[%c1_385, %c0_386, %c28_387] : memref<4x8x128xbf16, #tpu.memory_space<vmem>>, vector<1x8x72xbf16>
    %472 = vector.shape_cast %471 : vector<1x8x72xbf16> to vector<8x72xbf16>
    %c7_388 = arith.constant 7 : index
    %c0_389 = arith.constant 0 : index
    %c0_390 = arith.constant 0 : index
    %473 = vector.load %arg6[%c7_388, %c0_389, %c0_390] : memref<9x32x8xbf16, #tpu.memory_space<vmem>>, vector<1x32x8xbf16>
    %474 = vector.shape_cast %473 : vector<1x32x8xbf16> to vector<32x8xbf16>
    %cst_391 = arith.constant dense<0.000000e+00> : vector<32x72xf32>
    %475 = tpu.matmul %474, %472, %cst_391 {dimension_numbers = #tpu.dot_dimension_numbers<[1], [0], [0], [1], [0, 0, 1, 1], [], []>} : vector<32x8xbf16>, vector<8x72xbf16>, vector<32x72xf32> -> vector<32x72xf32>
    %476 = arith.addf %470, %475 : vector<32x72xf32>
    %c0_392 = arith.constant 0 : index
    %c0_393 = arith.constant 0 : index
    %c28_394 = arith.constant 28 : index
    %477 = vector.load %arg9[%c0_392, %c0_393, %c28_394] : memref<4x8x128xbf16, #tpu.memory_space<vmem>>, vector<1x8x72xbf16>
    %478 = vector.shape_cast %477 : vector<1x8x72xbf16> to vector<8x72xbf16>
    %c8_395 = arith.constant 8 : index
    %c0_396 = arith.constant 0 : index
    %c0_397 = arith.constant 0 : index
    %479 = vector.load %arg6[%c8_395, %c0_396, %c0_397] : memref<9x32x8xbf16, #tpu.memory_space<vmem>>, vector<1x32x8xbf16>
    %480 = vector.shape_cast %479 : vector<1x32x8xbf16> to vector<32x8xbf16>
    %cst_398 = arith.constant dense<0.000000e+00> : vector<32x72xf32>
    %481 = tpu.matmul %480, %478, %cst_398 {dimension_numbers = #tpu.dot_dimension_numbers<[1], [0], [0], [1], [0, 0, 1, 1], [], []>} : vector<32x8xbf16>, vector<8x72xbf16>, vector<32x72xf32> -> vector<32x72xf32>
    %482 = arith.addf %476, %481 : vector<32x72xf32>
    %483 = math.tanh %482 : vector<32x72xf32>
    %c96 = arith.constant 96 : index
    %c28_399 = arith.constant 28 : index
    %484 = vector.load %arg7[%c96, %c28_399] : memref<128x128xf32, #tpu.memory_space<vmem>>, vector<32x72xf32>
    tpu.vector_store %arg7[%c96, %c28_399], %483 {strides = array<i32>} : memref<128x128xf32, #tpu.memory_space<vmem>>, vector<32x72xf32>,
    return
  }
}

</mosaic_0001>

<bundles_post_ra>
// kernel: _lambda_.1
= control target key start
LH: loop header
LB: loop body
LE: loop exit
PB: predicated region body
PF: predicated region fallthrough
CT: control target
= control target key end

     0   :  { %v5250_v0 = vmov 0.0   ;;  %vm5251_vm0 = vmmov 0   ;;  %vm190_vm1 = vcmask 130048   ;;  %s5252_s21 = smov 100   ;;  %s5253_s22 = smov 95   ;;  %v5261_v33 = vmov 0   ;;  %s5928_s0 = inlined_call_operand.vmem [shape: bf16[128,128], index: 0, kind: input, shape index: {}]   ;;  %s5929_s1 = inlined_call_operand.vmem [shape: bf16[16,128], index: 1, kind: input, shape index: {}]   ;;  %s5930_s3 = inlined_call_operand.vmem [shape: bf16[9,32,16], index: 3, kind: input, shape index: {}]   ;;  %s5931_s4 = inlined_call_operand.vmem [shape: f32[8,1], index: 4, kind: input, shape index: {}]   ;;  %s5932_s5 = inlined_call_operand.vmem [shape: f32[8,1], index: 5, kind: input, shape index: {}]   ;;  %s5933_s2 = inlined_call_operand.vmem [shape: f32[1,72], index: 2, kind: input, shape index: {}]   ;;  %s5934_s6 = inlined_call_operand.vmem [shape: bf16[9,32,8], index: 6, kind: input, shape index: {}]   ;;  %s5935_s7 = inlined_call_operand.vmem [shape: f32[128,128], index: 7, kind: output, shape index: {}]  }
   0x1   :  { %4574 = vmatprep.subr.bf16.mxu0 %v5250_v0  ;;  %v5075_v1 = vld [vmem:[%s5928_s0] sm:$0xff]   ;;  %4590 = vmatprep.mubr.msk.bf16.mxu0 %vm5251_vm0, %v5250_v0  ;;  %v5076_v2 = vld [vmem:[%s5928_s0 + $0x8] sm:$0xff]   ;;  %v5077_v3 = vld [vmem:[%s5928_s0 + $0x10] sm:$0xff]   ;;  %s5254_s23 = smov 101   ;;  %s5255_s24 = smov 99   ;;  %vm861_vm2 = vcmask 588800  }
   0x2   :  { %4575 = vmatpush3.bf16.msra.mxu0 %v5075_v1  ;;  %v5078_v4 = vld [vmem:[%s5928_s0 + $0x18] sm:$0xff]   ;;  %v5079_v5 = vld [vmem:[%s5928_s0 + $0x20] sm:$0xff]   ;;  %v5080_v6 = vld [vmem:[%s5928_s0 + $0x28] sm:$0xff]   ;;  %s5256_s25 = smov 94   ;;  %s5257_s26 = smov 105   ;;  %5073 = vset.pattern.permute.xlu1 %v5261_v33  ;;  %vm920_vm11 = vcmask 814304  }
   0x3   :  { %4576 = vmatprep.subr.bf16.mxu0 %v5250_v0  ;;  %v5081_v7 = vld [vmem:[%s5928_s0 + $0x30] sm:$0xff]   ;;  %v5082_v8 = vld [vmem:[%s5928_s0 + $0x38] sm:$0xff]   ;;  %v5083_v9 = vld [vmem:[%s5929_s1] sm:$0xff]   ;;  %s5258_s27 = smov 93   ;;  %s5259_s28 = smov 106   ;;  %5074 = vset.pattern.permute.xlu0 %v5261_v33  ;;  %vm1125_vm12 = vcmask 64512  }
   0x4   :  { %v5084_v22 = vld [vmem:[%s5930_s3 + $0x20] sm:$0xff]   ;;  %v5086_v31 = vld [vmem:[%s5930_s3 + $0x10] sm:$0xff]   ;;  %s5260_s29 = smov 107   ;;  %28 = vst [vmem:[#allocation3] sm:$0xf] %v5261_v33  ;;  %v5085_v38 = vld [vmem:[%s5930_s3 + $0x28] sm:$0xff]  }
   0x5   :  { %4608 = vmatprep.mubr.msk.bf16.mxu1 %vm190_vm1, %v5084_v22  ;;  %30 = vst [vmem:[#allocation3 + $0x4] sm:$0xf] %v5261_v33  ;;  %32 = vst [vmem:[#allocation3 + $0x8] sm:$0xf] %v5261_v33  ;;  %v1017_v34 = vld [vmem:[%s5931_s4] sm:$0xff]  ;;  %v5088_v39 = vld [vmem:[%s5930_s3 + $0x30] sm:$0xff]  }
   0x6   :  { %4577 = vmatpush3.bf16.msra.mxu0 %v5076_v2  ;;  %34 = vst [vmem:[#allocation3 + $0xc] sm:$0xf] %v5261_v33  ;;  %v1024_v35 = vld [vmem:[%s5932_s5] sm:$0xff]  ;;  %v5087_v43 = vld [vmem:[%s5930_s3 + $0x18] sm:$0xff]   ;;  %v5097_v48 = vld [vmem:[%s5930_s3 + $0x8] sm:$0xff]   ;;  %s5262_s8 = smov 28  }
   0x7   :  { %4578 = vmatprep.subr.bf16.mxu0 %v5250_v0  ;;  %v5096_v44 = vld [vmem:[%s5930_s3] sm:$0xff]   ;;  %v5089_v46 = vld [vmem:[%s5930_s3 + $0x38] sm:$0xff]   ;;  %v5091_v49 = vld [vmem:[%s5930_s3 + $0x48] sm:$0xff]   ;;  %vm1132_vm13 = vcmask 1043456   ;;  %vm1839_vm14 = vcmask 818400  }
   0x8   :  { %v5090_v47 = vld [vmem:[%s5930_s3 + $0x40] sm:$0xff]   ;;  %v5092_v50 = vld [vmem:[%s5930_s3 + $0x50] sm:$0xff]   ;;  %v5093_v52 = vld [vmem:[%s5930_s3 + $0x58] sm:$0xff]  }
   0x9   :  { %v5094_v53 = vld [vmem:[%s5930_s3 + $0x60] sm:$0xff]   ;;  %v5095_v55 = vld [vmem:[%s5930_s3 + $0x68] sm:$0xff]   ;;  %v5098_v56 = vld [vmem:[%s5930_s3 + $0x70] sm:$0xff]  }
   0xa   :  { %4579 = vmatpush3.bf16.msra.mxu0 %v5077_v3  ;;  %v5099_v58 = vld [vmem:[%s5930_s3 + $0x78] sm:$0xff]   ;;  %v5100_v59 = vld [vmem:[%s5930_s3 + $0x80] sm:$0xff]   ;;  %v5101_v60 = vld [vmem:[%s5930_s3 + $0x88] sm:$0xff]  }
   0xb   :  { %4580 = vmatprep.subr.bf16.mxu0 %v5250_v0 }
   0xe   :  { %4581 = vmatpush3.bf16.msra.mxu0 %v5078_v4 }
   0xf   :  { %4582 = vmatprep.subr.bf16.mxu0 %v5250_v0 }
  0x12   :  { %4583 = vmatpush3.bf16.msra.mxu0 %v5079_v5 }
  0x13   :  { %4584 = vmatprep.subr.bf16.mxu0 %v5250_v0 }
  0x16   :  { %4585 = vmatpush3.bf16.msra.mxu0 %v5080_v6 }
  0x17   :  { %4586 = vmatprep.subr.bf16.mxu0 %v5250_v0 }
  0x1a   :  { %4587 = vmatpush3.bf16.msra.mxu0 %v5081_v7 }
  0x1b   :  { %4588 = vmatprep.subr.bf16.mxu0 %v5250_v0 }
  0x1e   :  { %4589 = vmatpush3.bf16.msra.mxu0 %v5082_v8 }
  0x21   :  { %4591 = vmatmul.mubr.bf16.vlgmr.msra.gmra.mrb[0].mxu0 %v5083_v9 }
  0x22   :  { %4596 = vmatprep.mubr.msk.bf16.mxu0 %vm190_vm1, %v5086_v31 }
  0xf4   :  { %v141_v10 = vpop.f32.mrb[0].mxu0 }
  0xf5   :  { %v150_v11 = vmin.f32 %v141_v10, 0.0  ;;  %v4592_v12 = vpop.f32.mrb[1].mxu0  ;;  %v148_v21 = vmax.f32 %v141_v10, 0.0 }
  0xf6   :  { %v144_v13 = vpop.f32.mrb[2].mxu0 }
  0xf7   :  { %v152_v14 = vmul.f32 1.442695, %v150_v11  ;;  %v151_v15 = vmin.f32 %v144_v13, 0.0  ;;  %v4593_v16 = vpop.f32.mrb[3].mxu0  ;;  %v149_v24 = vmax.f32 %v144_v13, 0.0 }
  0xf9   :  { %5190 = vpow2.f32 %v152_v14  ;;  %v154_v17 = vmul.f32 1.442695, %v151_v15 }
  0xfb   :  { %5192 = vpow2.f32 %v154_v17 }
 0x103   :  { %v5191_v18 = vpop.eup %5190 }
 0x104   :  { %v4059_v19 = vadd.f32 -1.0, %v5191_v18 }
 0x105   :  { %v5193_v20 = vpop.eup %5192 }
 0x106   :  { %v158_v23 = vmul.f32 1.6732632, %v4059_v19  ;;  %v4060_v25 = vadd.f32 -1.0, %v5193_v20 }
 0x108   :  { %v160_v26 = vadd.f32 %v158_v23, %v148_v21  ;;  %v159_v27 = vmul.f32 1.6732632, %v4060_v25 }
 0x10a   :  { %v162_v28 = vmul.f32 1.050701, %v160_v26  ;;  %v161_v29 = vadd.f32 %v159_v27, %v149_v24 }
 0x10c   :  { %v163_v30 = vmul.f32 1.050701, %v161_v29 }
 0x10e   :  { %v164_v32 = vpack.c.bf16 %v163_v30, %v162_v28 }
 0x110   :  { %483 = vrot.lane.b32.xlu1 %v164_v32, %s5252_s21  ;;  %329 = vrot.lane.b32.xlu0 %v164_v32, %s5253_s22 }
 0x114   :  { %560 = vrot.lane.b32.xlu1 %v164_v32, %s5254_s23  ;;  %406 = vrot.lane.b32.xlu0 %v164_v32, %s5255_s24 }
 0x118   :  { %187 = vrot.lane.b32.xlu1 %v164_v32, %s5256_s25  ;;  %637 = vrot.lane.b32.xlu0 %v164_v32, %s5257_s26 }
 0x11c   :  { %256 = vrot.lane.b32.xlu1 %v164_v32, %s5258_s27  ;;  %714 = vrot.lane.b32.xlu0 %v164_v32, %s5259_s28 }
 0x120   :  { %791 = vrot.lane.b32.xlu0 %v164_v32, %s5260_s29  ;;  %1020 = vperm.xlu1 %5073, %v1017_v34  }
 0x124   :  { %1079 = vperm.xlu0 %5074, %v1017_v34   ;;  %1027 = vperm.xlu1 %5073, %v1024_v35  }
 0x128   :  { %895 = vperm.xlu0 %5074, %v1017_v34   ;;  %1086 = vperm.xlu1 %5073, %v1024_v35  }
 0x12c   :  { %902 = vperm.xlu0 %5074, %v1024_v35   ;;  %961 = vperm.xlu1 %5073, %v1017_v34  }
 0x130   :  { %968 = vperm.xlu1 %5073, %v1024_v35  }
 0x182   :  { %v484_v36 = vpop.permute.xlu1 %483  ;;  %v330_v37 = vpop.permute.xlu0 %329 }
 0x183   :  { %4606 = vmatprep.subr.bf16.mxu1 %v330_v37 }
 0x184   :  { %4607 = vmatpush3.bf16.msra.mxu1 %v330_v37 }
 0x186   :  { %v561_v40 = vpop.permute.xlu1 %560  ;;  %v407_v41 = vpop.permute.xlu0 %406 }
 0x187   :  { %4609 = vmatmul.mubr.msk.bf16.vlgmr.msra.gmra.mrb[0].mxu1 %vm190_vm1, %v5085_v38  ;;  %4612 = vmatprep.subr.bf16.mxu1 %v407_v41 }
 0x188   :  { %4613 = vmatpush3.bf16.msra.mxu1 %v407_v41  ;;  %4614 = vmatprep.mubr.msk.bf16.mxu1 %vm190_vm1, %v5088_v39 }
 0x189   :  { %4618 = vmatprep.subr.bf16.mxu1 %v484_v36 }
 0x18a   :  { %v188_v42 = vpop.permute.xlu1 %187  ;;  %v638_v51 = vpop.permute.xlu0 %637 }
 0x18b   :  { %4594 = vmatprep.subr.bf16.mxu0 %v188_v42 }
 0x18c   :  { %4595 = vmatpush3.bf16.msra.mxu0 %v188_v42 }
 0x18e   :  { %v257_v45 = vpop.permute.xlu1 %256  ;;  %v715_v54 = vpop.permute.xlu0 %714 }
 0x18f   :  { %4600 = vmatprep.subr.bf16.mxu0 %v257_v45  ;;  %4597 = vmatmul.mubr.msk.bf16.vlgmr.msra.gmra.mrb[4].mxu0 %vm190_vm1, %v5087_v43 }
 0x190   :  { %4601 = vmatpush3.bf16.msra.mxu0 %v257_v45  ;;  %4602 = vmatprep.mubr.msk.bf16.mxu0 %vm190_vm1, %v5096_v44 }
 0x192   :  { %v792_v57 = vpop.permute.xlu0 %791 }
 0x193   :  { %4615 = vmatmul.mubr.msk.bf16.vlgmr.msra.gmra.mrb[0].mxu1 %vm190_vm1, %v5089_v46 }
 0x194   :  { %4619 = vmatpush3.bf16.msra.mxu1 %v484_v36  ;;  %4620 = vmatprep.mubr.msk.bf16.mxu1 %vm190_vm1, %v5090_v47 }
 0x195   :  { %4624 = vmatprep.subr.bf16.mxu1 %v561_v40 }
 0x19b   :  { %4603 = vmatmul.mubr.msk.bf16.vlgmr.msra.gmra.mrb[4].mxu0 %vm190_vm1, %v5097_v48 }
 0x19f   :  { %4621 = vmatmul.mubr.msk.bf16.vlgmr.msra.gmra.mrb[0].mxu1 %vm190_vm1, %v5091_v49 }
 0x1a0   :  { %4625 = vmatpush3.bf16.msra.mxu1 %v561_v40  ;;  %4626 = vmatprep.mubr.msk.bf16.mxu1 %vm190_vm1, %v5092_v50 }
 0x1a1   :  { %4630 = vmatprep.subr.bf16.mxu1 %v638_v51 }
 0x1ab   :  { %4627 = vmatmul.mubr.msk.bf16.vlgmr.msra.gmra.mrb[0].mxu1 %vm190_vm1, %v5093_v52 }
 0x1ac   :  { %4631 = vmatpush3.bf16.msra.mxu1 %v638_v51  ;;  %4632 = vmatprep.mubr.msk.bf16.mxu1 %vm190_vm1, %v5094_v53 }
 0x1ad   :  { %4636 = vmatprep.subr.bf16.mxu1 %v715_v54 }
 0x1b7   :  { %4633 = vmatmul.mubr.msk.bf16.vlgmr.msra.gmra.mrb[0].mxu1 %vm190_vm1, %v5095_v55 }
 0x1b8   :  { %4637 = vmatpush3.bf16.msra.mxu1 %v715_v54  ;;  %4638 = vmatprep.mubr.msk.bf16.mxu1 %vm190_vm1, %v5098_v56 }
 0x1b9   :  { %4642 = vmatprep.subr.bf16.mxu1 %v792_v57 }
 0x1c3   :  { %4639 = vmatmul.mubr.msk.bf16.vlgmr.msra.gmra.mrb[0].mxu1 %vm190_vm1, %v5099_v58 }
 0x1c4   :  { %4643 = vmatpush3.bf16.msra.mxu1 %v792_v57  ;;  %4644 = vmatprep.mubr.msk.bf16.mxu1 %vm190_vm1, %v5100_v59 }
 0x1cf   :  { %4645 = vmatmul.mubr.msk.bf16.vlgmr.msra.gmra.mrb[0].mxu1 %vm190_vm1, %v5101_v60 }
 0x26e   :  { %v4604_v61 = vpop.f32.mrb[4].mxu0 }
 0x26f   :  { %v299_v62 = vpop.f32.mrb[5].mxu0 }
 0x270   :  { %v4605_v63 = vpop.f32.mrb[6].mxu0 }
 0x271   :  { %v302_v0 = vpop.f32.mrb[7].mxu0 }
 0x2a2   :  { %v4646_v1 = vpop.f32.mrb[0].mxu1 }
 0x2a3   :  { %v4864_v2 = vadd.f32 %v4646_v1, %v4604_v61  ;;  %v834_v3 = vpop.f32.mrb[1].mxu1 }
 0x2a4   :  { %v4865_v4 = vadd.f32 %v834_v3, %v299_v62  ;;  %v4647_v5 = vpop.f32.mrb[2].mxu1 }
 0x2a5   :  { %v982_v6 = vmin.f32 %v4864_v2, 0.0  ;;  %v4866_v7 = vadd.f32 %v4647_v5, %v4605_v63  ;;  %v837_v8 = vpop.f32.mrb[3].mxu1  ;;  %v981_v23 = vmax.f32 %v4864_v2, 0.0 }
 0x2a6   :  { %v854_v9 = vmin.f32 %v4865_v4, 0.0  ;;  %v4867_v10 = vadd.f32 %v837_v8, %v302_v0  ;;  %v853_v26 = vmax.f32 %v4865_v4, 0.0 }
 0x2a7   :  { %v983_v11 = vmul.f32 1.442695, %v982_v6  ;;  %v1041_v12 = vmin.f32 %v4866_v7, 0.0  ;;  %v1040_v30 = vmax.f32 %v4866_v7, 0.0 }
 0x2a8   :  { %v855_v13 = vmul.f32 1.442695, %v854_v9  ;;  %v923_v14 = vmin.f32 %v4867_v10, 0.0  ;;  %v922_v33 = vmax.f32 %v4867_v10, 0.0 }
 0x2a9   :  { %5194 = vpow2.f32 %v983_v11  ;;  %v1042_v15 = vmul.f32 1.442695, %v1041_v12 }
 0x2aa   :  { %5196 = vpow2.f32 %v855_v13  ;;  %v924_v16 = vmul.f32 1.442695, %v923_v14 }
 0x2ab   :  { %5198 = vpow2.f32 %v1042_v15 }
 0x2ac   :  { %5200 = vpow2.f32 %v924_v16 }
 0x2b3   :  { %v5195_v17 = vpop.eup %5194 }
 0x2b4   :  { %v5197_v18 = vpop.eup %5196  ;;  %v4134_v19 = vadd.f32 -1.0, %v5195_v17 }
 0x2b5   :  { %v5199_v20 = vpop.eup %5198  ;;  %v4129_v21 = vadd.f32 -1.0, %v5197_v18 }
 0x2b6   :  { %v5201_v22 = vpop.eup %5200  ;;  %v986_v24 = vmul.f32 1.6732632, %v4134_v19  ;;  %v4136_v25 = vadd.f32 -1.0, %v5199_v20 }
 0x2b7   :  { %v858_v27 = vmul.f32 1.6732632, %v4129_v21  ;;  %v4132_v28 = vadd.f32 -1.0, %v5201_v22 }
 0x2b8   :  { %v987_v29 = vadd.f32 %v986_v24, %v981_v23  ;;  %v1045_v31 = vmul.f32 1.6732632, %v4136_v25 }
 0x2b9   :  { %v859_v32 = vadd.f32 %v858_v27, %v853_v26  ;;  %v927_v34 = vmul.f32 1.6732632, %v4132_v28 }
 0x2ba   :  { %v988_v35 = vmul.f32 1.050701, %v987_v29  ;;  %v1046_v36 = vadd.f32 %v1045_v31, %v1040_v30 }
 0x2bb   :  { %v860_v37 = vmul.f32 1.050701, %v859_v32  ;;  %v928_v38 = vadd.f32 %v927_v34, %v922_v33 }
 0x2bc   :  { %v989_v39 = vsel %vm861_vm2, %v988_v35, 0.0  ;;  %v1047_v40 = vmul.f32 1.050701, %v1046_v36 }
 0x2bd   :  { %v990_v41 = vrot.slane %v989_v39, 4  ;;  %v862_v42 = vsel %vm861_vm2, %v860_v37, 0.0  ;;  %v929_v43 = vmul.f32 1.050701, %v928_v38 }
 0x2be   :  { %v863_v44 = vrot.slane %v862_v42, 4  ;;  %v1048_v45 = vsel %vm861_vm2, %v1047_v40, 0.0 }
 0x2bf   :  { %v991_v46 = vadd.f32 %v990_v41, %v989_v39  ;;  %v1049_v47 = vrot.slane %v1048_v45, 4  ;;  %v930_v48 = vsel %vm861_vm2, %v929_v43, 0.0 }
 0x2c0   :  { %v864_v49 = vadd.f32 %v863_v44, %v862_v42  ;;  %v931_v50 = vrot.slane %v930_v48, 4 }
 0x2c1   :  { %v992_v51 = vrot.slane %v991_v46, 2  ;;  %v1050_v52 = vadd.f32 %v1049_v47, %v1048_v45 }
 0x2c2   :  { %v865_v53 = vrot.slane %v864_v49, 2  ;;  %v932_v54 = vadd.f32 %v931_v50, %v930_v48 }
 0x2c3   :  { %v1051_v55 = vrot.slane %v1050_v52, 2  ;;  %v993_v56 = vadd.f32 %v992_v51, %v991_v46  ;;  %v1021_v51 = vpop.permute.xlu1 %1020 }
 0x2c4   :  { %v933_v57 = vrot.slane %v932_v54, 2  ;;  %v866_v58 = vadd.f32 %v865_v53, %v864_v49 }
 0x2c5   :  { %v994_v59 = vrot.slane %v993_v56, 1  ;;  %v1052_v60 = vadd.f32 %v1051_v55, %v1050_v52 }
 0x2c6   :  { %v934_v61 = vadd.f32 %v933_v57, %v932_v54  ;;  %v867_v62 = vrot.slane %v866_v58, 1 }
 0x2c7   :  { %v995_v63 = vadd.f32 %v994_v59, %v993_v56  ;;  %v1053_v0 = vrot.slane %v1052_v60, 1 }
 0x2c8   :  { %v935_v1 = vrot.slane %v934_v61, 1  ;;  %v868_v2 = vadd.f32 %v867_v62, %v866_v58 }
 0x2c9   :  { %v996_v3 = vmul.f32 0.125, %v995_v63  ;;  %v1054_v4 = vadd.f32 %v1053_v0, %v1052_v60 }
 0x2ca   :  { %v936_v5 = vadd.f32 %v935_v1, %v934_v61  ;;  %v870_v6 = vmul.f32 0.125, %v868_v2 }
 0x2cb   :  { %v5421_v7 = vsub.f32 %v988_v35, %v996_v3  ;;  %v1055_v8 = vmul.f32 0.125, %v1054_v4 }
 0x2cc   :  { %v937_v9 = vmul.f32 0.125, %v936_v5  ;;  %v5423_v10 = vsub.f32 %v860_v37, %v870_v6  ;;  %v1028_v5 = vpop.permute.xlu1 %1027 }
 0x2cd   :  { %v998_v11 = vmul.f32 %v5421_v7, %v5421_v7  ;;  %v5427_v12 = vsub.f32 %v1047_v40, %v1055_v8 }
 0x2ce   :  { %v5429_v13 = vsub.f32 %v929_v43, %v937_v9  ;;  %v872_v14 = vmul.f32 %v5423_v10, %v5423_v10 }
 0x2cf   :  { %v999_v15 = vsel %vm861_vm2, %v998_v11, 0.0  ;;  %v1057_v16 = vmul.f32 %v5427_v12, %v5427_v12  ;;  %v1080_v11 = vpop.permute.xlu0 %1079 }
 0x2d0   :  { %v1000_v17 = vrot.slane %v999_v15, 4  ;;  %v939_v18 = vmul.f32 %v5429_v13, %v5429_v13  ;;  %v873_v19 = vsel %vm861_vm2, %v872_v14, 0.0 }
 0x2d1   :  { %v1058_v20 = vsel %vm861_vm2, %v1057_v16, 0.0  ;;  %v874_v21 = vrot.slane %v873_v19, 4  ;;  %v1087_v16 = vpop.permute.xlu1 %1086 }
 0x2d2   :  { %v1001_v22 = vadd.f32 %v1000_v17, %v999_v15  ;;  %v940_v23 = vsel %vm861_vm2, %v939_v18, 0.0  ;;  %v1059_v24 = vrot.slane %v1058_v20, 4 }
 0x2d3   :  { %v941_v25 = vrot.slane %v940_v23, 4  ;;  %v875_v26 = vadd.f32 %v874_v21, %v873_v19  ;;  %v896_v17 = vpop.permute.xlu0 %895 }
 0x2d4   :  { %v1002_v27 = vrot.slane %v1001_v22, 2  ;;  %v1060_v28 = vadd.f32 %v1059_v24, %v1058_v20 }
 0x2d5   :  { %v942_v29 = vadd.f32 %v941_v25, %v940_v23  ;;  %v876_v30 = vrot.slane %v875_v26, 2  ;;  %v962_v21 = vpop.permute.xlu1 %961 }
 0x2d6   :  { %v1003_v31 = vadd.f32 %v1002_v27, %v1001_v22  ;;  %v1061_v32 = vrot.slane %v1060_v28, 2  ;;  %v4130_v27 = vld [vmem:[%s5933_s2] ss:$0 sm:$0xff] }
 0x2d7   :  { %v943_v33 = vrot.slane %v942_v29, 2  ;;  %v877_v34 = vadd.f32 %v876_v30, %v875_v26  ;;  %v903_v25 = vpop.permute.xlu0 %902 }
 0x2d8   :  { %v1004_v35 = vrot.slane %v1003_v31, 1  ;;  %v1062_v36 = vadd.f32 %v1061_v32, %v1060_v28 }
 0x2d9   :  { %v944_v37 = vadd.f32 %v943_v33, %v942_v29  ;;  %v878_v38 = vrot.slane %v877_v34, 1 }
 0x2da   :  { %v1005_v39 = vadd.f32 %v1004_v35, %v1003_v31  ;;  %v1063_v40 = vrot.slane %v1062_v36, 1  ;;  %v969_v35 = vpop.permute.xlu1 %968 }
 0x2db   :  { %v945_v41 = vrot.slane %v944_v37, 1  ;;  %v879_v42 = vadd.f32 %v878_v38, %v877_v34 }
 0x2dc   :  { %v1006_v43 = vmul.f32 0.14285715, %v1005_v39  ;;  %v1064_v44 = vadd.f32 %v1063_v40, %v1062_v36 }
 0x2dd   :  { %v946_v45 = vadd.f32 %v945_v41, %v944_v37  ;;  %v881_v46 = vmul.f32 0.14285715, %v879_v42 }
 0x2de   :  { %5202 = vrsqrt.f32 %v1006_v43  ;;  %v1065_v48 = vmul.f32 0.14285715, %v1064_v44  ;;  %vm1009_vm3 = vcmp.eq.f32.partialorder %v1006_v43, inf  ;;  %vm1011_vm4 = vcmp.eq.f32.partialorder %v1006_v43, 0.0 }
 0x2df   :  { %v947_v47 = vmul.f32 0.14285715, %v946_v45  ;;  %5204 = vrsqrt.f32 %v881_v46  ;;  %v1012_v53 = vand.u32 2147483648, %v1006_v43  ;;  %vm884_vm5 = vcmp.eq.f32.partialorder %v881_v46, inf }
 0x2e0   :  { %vm886_vm7 = vcmp.eq.f32.partialorder %v881_v46, 0.0  ;;  %v887_v57 = vand.u32 2147483648, %v881_v46  ;;  %vm1068_vm9 = vcmp.eq.f32.partialorder %v1065_v48, inf  ;;  %v1071_v3 = vand.u32 2147483648, %v1065_v48 }
 0x2e1   :  { %5206 = vrsqrt.f32 %v947_v47  ;;  %vm950_vm6 = vcmp.eq.f32.partialorder %v947_v47, inf  ;;  %vm952_vm8 = vcmp.eq.f32.partialorder %v947_v47, 0.0  ;;  %v953_v63 = vand.u32 2147483648, %v947_v47 }
 0x2e2   :  { %5208 = vrsqrt.f32 %v1065_v48  ;;  %vm1070_vm10 = vcmp.eq.f32.partialorder %v1065_v48, 0.0 }
 0x2e8   :  { %v5203_v49 = vpop.eup %5202 }
 0x2e9   :  { %v5205_v50 = vpop.eup %5204  ;;  %v1008_v52 = vmul.f32 %v5203_v49, %v1006_v43 }
 0x2ea   :  { %v883_v54 = vmul.f32 %v5205_v50, %v881_v46 }
 0x2eb   :  { %v5207_v55 = vpop.eup %5206  ;;  %v1010_v56 = vsel %vm1009_vm3, %v1006_v43, %v1008_v52  ;;  %v5118_v43 = vld [vmem:[%s5934_s6 + $0x10] sm:$0xff]  }
 0x2ec   :  { %v5209_v58 = vpop.eup %5208  ;;  %v1013_v59 = vsel %vm1011_vm4, %v1012_v53, %v1010_v56  ;;  %v949_v60 = vmul.f32 %v5207_v55, %v947_v47  ;;  %v885_v61 = vsel %vm884_vm5, %v881_v46, %v883_v54  ;;  %4650 = vmatprep.mubr.msk.bf16.mxu0 %vm1125_vm12, %v5118_v43  ;;  %v5120_v46 = vld [vmem:[%s5934_s6 + $0x10] sm:$0xff]  }
 0x2ed   :  { %v1014_v62 = vadd.f32 1e-09, %v1013_v59  ;;  %v1067_v0 = vmul.f32 %v5209_v58, %v1065_v48  ;;  %v888_v1 = vsel %vm886_vm7, %v887_v57, %v885_v61  ;;  %4704 = vmatprep.mubr.msk.bf16.mxu1 %vm1125_vm12, %v5120_v46  ;;  %v5140_v43 = vld [vmem:[%s5934_s6 + $0x50] sm:$0xff]   ;;  %v5139_v46 = vld [vmem:[%s5934_s6 + $0x58] sm:$0xff]  }
 0x2ee   :  { %v951_v2 = vsel %vm950_vm6, %v947_v47, %v949_v60  ;;  %v889_v4 = vadd.f32 1e-09, %v888_v1 }
 0x2ef   :  { %5210 = vrcp.f32 %v1014_v62  ;;  %v954_v6 = vsel %vm952_vm8, %v953_v63, %v951_v2  ;;  %v1069_v8 = vsel %vm1068_vm9, %v1065_v48, %v1067_v0  ;;  %v5119_v2 = vld [vmem:[%s5934_s6 + $0x18] sm:$0xff]  }
 0x2f0   :  { %v955_v9 = vadd.f32 1e-09, %v954_v6  ;;  %v1072_v14 = vsel %vm1070_vm10, %v1071_v3, %v1069_v8  ;;  %5212 = vrcp.f32 %v889_v4  ;;  %v5122_v3 = vld [vmem:[%s5934_s6] sm:$0xff]   ;;  %v5121_v8 = vld [vmem:[%s5934_s6 + $0x18] sm:$0xff]  }
 0x2f1   :  { %v1073_v15 = vadd.f32 1e-09, %v1072_v14 }
 0x2f2   :  { %5214 = vrcp.f32 %v955_v9 }
 0x2f3   :  { %5216 = vrcp.f32 %v1073_v15 }
 0x2f9   :  { %v5211_v18 = vpop.eup %5210 }
 0x2fa   :  { %v5213_v19 = vpop.eup %5212  ;;  %v1016_v20 = vmul.f32 %v5211_v18, %v5421_v7  ;;  %v5123_v18 = vld [vmem:[%s5934_s6 + $0x8] sm:$0xff]  }
 0x2fb   :  { %v891_v22 = vmul.f32 %v5213_v19, %v5423_v10  ;;  %v5126_v19 = vld [vmem:[%s5934_s6 + $0x20] sm:$0xff]  }
 0x2fc   :  { %v5215_v23 = vpop.eup %5214  ;;  %v1023_v24 = vmul.f32 %v1021_v51, %v1016_v20 }
 0x2fd   :  { %v5217_v26 = vpop.eup %5216  ;;  %v957_v28 = vmul.f32 %v5215_v23, %v5429_v13  ;;  %v898_v29 = vmul.f32 %v896_v17, %v891_v22  ;;  %v5128_v23 = vld [vmem:[%s5934_s6 + $0x20] sm:$0xff]  }
 0x2fe   :  { %v1030_v30 = vadd.f32 %v1028_v5, %v1023_v24  ;;  %v1075_v31 = vmul.f32 %v5217_v26, %v5427_v12  ;;  %v5127_v26 = vld [vmem:[%s5934_s6 + $0x28] sm:$0xff]  }
 0x2ff   :  { %v964_v32 = vmul.f32 %v962_v21, %v957_v28  ;;  %v905_v33 = vadd.f32 %v903_v25, %v898_v29  ;;  %v5125_v21 = vld [vmem:[%s5934_s6 + $0x8] sm:$0xff]  }
 0x300   :  { %v1031_v7 = vmul.f32 %v4130_v27, %v1030_v30  ;;  %v1082_v34 = vmul.f32 %v1080_v11, %v1075_v31  ;;  %v5124_v11 = vld [vmem:[%s5934_s6] sm:$0xff]   ;;  %v5129_v29 = vld [vmem:[%s5934_s6 + $0x28] sm:$0xff]   ;;  %v5132_v31 = vld [vmem:[%s5934_s6 + $0x30] sm:$0xff]  }
 0x301   :  { %v971_v37 = vadd.f32 %v969_v35, %v964_v32  ;;  %v912_v38 = vmul.f32 %v4130_v27, %v905_v33 }
 0x302   :  { %v4428_v10 = vpack.c.bf16 %v1031_v7, %v1031_v7  ;;  %v1089_v36 = vadd.f32 %v1087_v16, %v1082_v34  ;;  %v5131_v7 = vld [vmem:[%s5934_s6 + $0x38] sm:$0xff]   ;;  %v5134_v34 = vld [vmem:[%s5934_s6 + $0x40] sm:$0xff]  }
 0x303   :  { %v972_v40 = vmul.f32 %v4130_v27, %v971_v37  ;;  %v4426_v41 = vpack.c.bf16 %v912_v38, %v912_v38  ;;  %v5136_v37 = vld [vmem:[%s5934_s6 + $0x40] sm:$0xff]  }
 0x304   :  { %1036 = vrot.lane.b32.xlu0 %v4428_v10, %s5262_s8  ;;  %v1090_v39 = vmul.f32 %v4130_v27, %v1089_v36  ;;  %v5130_v27 = vld [vmem:[%s5934_s6 + $0x30] sm:$0xff]   ;;  %v5133_v10 = vld [vmem:[%s5934_s6 + $0x38] sm:$0xff]  }
 0x305   :  { %v4427_v12 = vpack.c.bf16 %v972_v40, %v972_v40  ;;  %v5135_v40 = vld [vmem:[%s5934_s6 + $0x48] sm:$0xff]  }
 0x306   :  { %v4429_v13 = vpack.c.bf16 %v1090_v39, %v1090_v39 }
 0x308   :  { %1095 = vrot.lane.b32.xlu1 %v4429_v13, %s5262_s8  ;;  %917 = vrot.lane.b32.xlu0 %v4426_v41, %s5262_s8  ;;  %v5138_v41 = vld [vmem:[%s5934_s6 + $0x50] sm:$0xff]  }
 0x30c   :  { %977 = vrot.lane.b32.xlu1 %v4427_v12, %s5262_s8  ;;  %v5137_v12 = vld [vmem:[%s5934_s6 + $0x48] sm:$0xff]  }
 0x376   :  { %v1037_v42 = vpop.permute.xlu0 %1036 }
 0x377   :  { %1039 = vst.msk [vmem:[#allocation3 + $0x8] sm:$0xf] %vm920_vm11, %v1037_v42 }
 0x37a   :  { %v1096_v44 = vpop.permute.xlu1 %1095  ;;  %v918_v45 = vpop.permute.xlu0 %917 }
 0x37b   :  { %1098 = vst.msk [vmem:[#allocation3 + $0xc] sm:$0xf] %vm920_vm11, %v1096_v44  ;;  %921 = vst.msk [vmem:[#allocation3] sm:$0xf] %vm920_vm11, %v918_v45 }
 0x37e   :  { %v978_v47 = vpop.permute.xlu1 %977  ;;  %v5102_v48 = vld [vmem:[#allocation3 + $0x8] ss:$0 sps:$4 sm:$0xff]  }
 0x37f   :  { %980 = vst.msk [vmem:[#allocation3 + $0x4] sm:$0xf] %vm920_vm11, %v978_v47  ;;  %1123 = vrot.lane.b32.xlu0 %v5102_v48, %s5252_s21  ;;  %v5105_v51 = vld [vmem:[#allocation3 + $0x8] ss:$0 sps:$4 sm:$0xff]   ;;  %v5142_v47 = vld [vmem:[%s5934_s6 + $0x60] sm:$0xff]  }
 0x380   :  { %v5115_v61 = vld [vmem:[#allocation3 + $0x8] ss:$0 sps:$4 sm:$0xff]  }
 0x381   :  { %v5116_v62 = vld [vmem:[#allocation3 + $0x8] ss:$0 sps:$4 sm:$0xff]  }
 0x382   :  { %v5103_v49 = vld [vmem:[#allocation3 + $0xc] ss:$0 sps:$4 sm:$0xff]   ;;  %v5107_v53 = vld [vmem:[#allocation3] ss:$0 sps:$4 sm:$0xff]  }
 0x383   :  { %v5104_v50 = vld [vmem:[#allocation3 + $0xc] ss:$0 sps:$4 sm:$0xff]   ;;  %1867 = vrot.lane.b32.xlu1 %v5103_v49, %s5252_s21  ;;  %v5108_v54 = vld [vmem:[#allocation3] ss:$0 sps:$4 sm:$0xff]  }
 0x384   :  { %1198 = vrot.lane.b32.xlu0 %v5104_v50, %s5252_s21  ;;  %v5110_v56 = vld [vmem:[#allocation3] ss:$0 sps:$4 sm:$0xff]   ;;  %v5114_v60 = vld [vmem:[#allocation3 + $0xc] ss:$0 sps:$4 sm:$0xff]  }
 0x385   :  { %v5113_v59 = vld [vmem:[#allocation3] ss:$0 sps:$4 sm:$0xff]   ;;  %v5117_v63 = vld [vmem:[#allocation3 + $0xc] ss:$0 sps:$4 sm:$0xff]  }
 0x386   :  { %v5106_v52 = vld [vmem:[#allocation3 + $0x4] ss:$0 sps:$4 sm:$0xff]  }
 0x387   :  { %1940 = vrot.lane.b32.xlu1 %v5105_v51, %s5255_s24  ;;  %v5109_v55 = vld [vmem:[#allocation3 + $0x4] ss:$0 sps:$4 sm:$0xff]  }
 0x388   :  { %1273 = vrot.lane.b32.xlu0 %v5104_v50, %s5254_s23  ;;  %v5111_v57 = vld [vmem:[#allocation3 + $0x4] ss:$0 sps:$4 sm:$0xff]  }
 0x389   :  { %v5112_v58 = vld [vmem:[#allocation3 + $0x4] ss:$0 sps:$4 sm:$0xff]  }
 0x38b   :  { %2014 = vrot.lane.b32.xlu1 %v5105_v51, %s5252_s21 }
 0x38c   :  { %1356 = vrot.lane.b32.xlu0 %v5106_v52, %s5252_s21 }
 0x38f   :  { %2096 = vrot.lane.b32.xlu1 %v5107_v53, %s5255_s24 }
 0x390   :  { %1439 = vrot.lane.b32.xlu0 %v5108_v54, %s5252_s21  ;;  %v5143_v54 = vld [vmem:[%s5934_s6 + $0x68] sm:$0xff]  }
 0x393   :  { %2178 = vrot.lane.b32.xlu1 %v5109_v55, %s5252_s21  ;;  %v5146_v55 = vld [vmem:[%s5934_s6 + $0x70] sm:$0xff]  }
 0x394   :  { %1518 = vrot.lane.b32.xlu0 %v5106_v52, %s5254_s23 }
 0x397   :  { %2256 = vrot.lane.b32.xlu1 %v5107_v53, %s5252_s21 }
 0x398   :  { %1597 = vrot.lane.b32.xlu0 %v5104_v50, %s5259_s28 }
 0x39b   :  { %2334 = vrot.lane.b32.xlu1 %v5105_v51, %s5257_s26 }
 0x39c   :  { %1676 = vrot.lane.b32.xlu0 %v5102_v48, %s5259_s28 }
 0x39f   :  { %2412 = vrot.lane.b32.xlu1 %v5103_v49, %s5259_s28  ;;  %v5141_v49 = vld [vmem:[%s5934_s6 + $0x58] sm:$0xff]  }
 0x3a0   :  { %1755 = vrot.lane.b32.xlu0 %v5104_v50, %s5260_s29 }
 0x3a3   :  { %2490 = vrot.lane.b32.xlu1 %v5105_v51, %s5259_s28  ;;  %v5144_v51 = vld [vmem:[%s5934_s6 + $0x60] sm:$0xff]  }
 0x3a4   :  { %2601 = vrot.lane.b32.xlu0 %v5110_v56, %s5256_s25 }
 0x3a7   :  { %3335 = vrot.lane.b32.xlu1 %v5111_v57, %s5256_s25 }
 0x3a8   :  { %2674 = vrot.lane.b32.xlu0 %v5112_v58, %s5256_s25 }
 0x3ab   :  { %3408 = vrot.lane.b32.xlu1 %v5113_v59, %s5258_s27 }
 0x3ac   :  { %2748 = vrot.lane.b32.xlu0 %v5112_v58, %s5253_s22 }
 0x3af   :  { %3482 = vrot.lane.b32.xlu1 %v5113_v59, %s5256_s25 }
 0x3b0   :  { %2830 = vrot.lane.b32.xlu0 %v5114_v60, %s5252_s21 }
 0x3b3   :  { %3564 = vrot.lane.b32.xlu1 %v5115_v61, %s5255_s24 }
 0x3b4   :  { %2912 = vrot.lane.b32.xlu0 %v5116_v62, %s5252_s21  ;;  %v5147_v62 = vld [vmem:[%s5934_s6 + $0x78] sm:$0xff]  }
 0x3b7   :  { %3646 = vrot.lane.b32.xlu1 %v5117_v63, %s5252_s21  ;;  %v5150_v63 = vld [vmem:[%s5934_s6 + $0x80] sm:$0xff]  }
 0x3b8   :  { %2990 = vrot.lane.b32.xlu0 %v5114_v60, %s5254_s23 }
 0x3bb   :  { %3724 = vrot.lane.b32.xlu1 %v5115_v61, %s5252_s21 }
 0x3bc   :  { %3068 = vrot.lane.b32.xlu0 %v5112_v58, %s5252_s21 }
 0x3bf   :  { %3802 = vrot.lane.b32.xlu1 %v5113_v59, %s5255_s24 }
 0x3c0   :  { %3146 = vrot.lane.b32.xlu0 %v5110_v56, %s5252_s21 }
 0x3c3   :  { %3880 = vrot.lane.b32.xlu1 %v5111_v57, %s5252_s21  ;;  %v5145_v57 = vld [vmem:[%s5934_s6 + $0x68] sm:$0xff]  }
 0x3c4   :  { %3224 = vrot.lane.b32.xlu0 %v5112_v58, %s5254_s23 }
 0x3c7   :  { %3958 = vrot.lane.b32.xlu1 %v5113_v59, %s5252_s21  ;;  %v5148_v59 = vld [vmem:[%s5934_s6 + $0x70] sm:$0xff]  }
 0x3f1   :  { %v1124_v0 = vpop.permute.xlu0 %1123 }
 0x3f2   :  { %v1134_v1 = vsel %vm1132_vm13, %v1124_v0, 0  ;;  %5024 = vmatprep.subr.msk.bf16.mxu0 %vm1132_vm13, %v1124_v0 }
 0x3f3   :  { %4649 = vmatpush3.bf16.msra.mxu0 %v1134_v1  ;;  %v5149_v1 = vld [vmem:[%s5934_s6 + $0x78] sm:$0xff]  }
 0x3f5   :  { %v1868_v4 = vpop.permute.xlu1 %1867 }
 0x3f6   :  { %v1876_v5 = vsel %vm1132_vm13, %v1868_v4, 0  ;;  %5033 = vmatprep.subr.msk.bf16.mxu1 %vm1132_vm13, %v1868_v4  ;;  %v1199_v6 = vpop.permute.xlu0 %1198  ;;  %4651 = vmatmul.mubr.msk.bf16.vlgmr.msra.gmra.mrb[8].mxu0 %vm1125_vm12, %v5119_v2 }
 0x3f7   :  { %v1207_v9 = vsel %vm1132_vm13, %v1199_v6, 0  ;;  %4703 = vmatpush3.bf16.msra.mxu1 %v1876_v5  ;;  %5025 = vmatprep.subr.msk.bf16.mxu0 %vm1132_vm13, %v1199_v6  ;;  %v5151_v6 = vld [vmem:[%s5934_s6 + $0x88] sm:$0xff]  }
 0x3f8   :  { %4655 = vmatpush3.bf16.msra.mxu0 %v1207_v9  ;;  %4656 = vmatprep.mubr.msk.bf16.mxu0 %vm1125_vm12, %v5122_v3  ;;  %v5152_v3 = vld [vmem:[%s5934_s6 + $0x80] sm:$0xff]  }
 0x3f9   :  { %v1941_v14 = vpop.permute.xlu1 %1940 }
 0x3fa   :  { %v1949_v15 = vsel %vm1132_vm13, %v1941_v14, 0  ;;  %4705 = vmatmul.mubr.msk.bf16.vlgmr.msra.gmra.mrb[4].mxu1 %vm1125_vm12, %v5121_v8  ;;  %5034 = vmatprep.subr.msk.bf16.mxu1 %vm1132_vm13, %v1941_v14  ;;  %v1274_v16 = vpop.permute.xlu0 %1273  ;;  %v5154_v8 = vld [vmem:[%s5934_s6 + $0x10] sm:$0xff]  }
 0x3fb   :  { %4709 = vmatpush3.bf16.msra.mxu1 %v1949_v15  ;;  %5026 = vmatprep.subr.msk.bf16.mxu0 %vm1132_vm13, %v1274_v16  ;;  %v1282_v20 = vsel %vm1132_vm13, %v1274_v16, 0  ;;  %v5156_v15 = vld [vmem:[%s5934_s6 + $0x10] sm:$0xff]  }
 0x3fc   :  { %4710 = vmatprep.mubr.msk.bf16.mxu1 %vm1125_vm12, %v5124_v11  ;;  %v5153_v11 = vld [vmem:[%s5934_s6 + $0x88] sm:$0xff]  }
 0x3fd   :  { %v2015_v17 = vpop.permute.xlu1 %2014 }
 0x3fe   :  { %5035 = vmatprep.subr.msk.bf16.mxu1 %vm1132_vm13, %v2015_v17  ;;  %v1357_v22 = vpop.permute.xlu0 %1356  ;;  %v2023_v24 = vsel %vm1132_vm13, %v2015_v17, 0  ;;  %v5155_v17 = vld [vmem:[%s5934_s6 + $0x18] sm:$0xff]  }
 0x3ff   :  { %v1365_v28 = vsel %vm1132_vm13, %v1357_v22, 0 }
 0x401   :  { %v2097_v25 = vpop.permute.xlu1 %2096 }
 0x402   :  { %4657 = vmatmul.mubr.msk.bf16.vlgmr.msra.gmra.mrb[8].mxu0 %vm1125_vm12, %v5123_v18  ;;  %v1440_v30 = vpop.permute.xlu0 %1439  ;;  %v2105_v32 = vsel %vm1132_vm13, %v2097_v25, 0 }
 0x403   :  { %4661 = vmatpush3.bf16.msra.mxu0 %v1282_v20  ;;  %4662 = vmatprep.mubr.msk.bf16.mxu0 %vm1125_vm12, %v5126_v19  ;;  %v1448_v35 = vsel %vm1132_vm13, %v1440_v30, 0  ;;  %v5158_v19 = vld [vmem:[%s5934_s6] sm:$0xff]  }
 0x404   :  { %5027 = vmatprep.subr.msk.bf16.mxu0 %vm1132_vm13, %v1357_v22 }
 0x405   :  { %v2179_v33 = vpop.permute.xlu1 %2178 }
 0x406   :  { %4711 = vmatmul.mubr.msk.bf16.vlgmr.msra.gmra.mrb[4].mxu1 %vm1125_vm12, %v5125_v21  ;;  %v1519_v36 = vpop.permute.xlu0 %1518  ;;  %v2187_v38 = vsel %vm1132_vm13, %v2179_v33, 0  ;;  %v5157_v21 = vld [vmem:[%s5934_s6 + $0x18] sm:$0xff]  }
 0x407   :  { %4715 = vmatpush3.bf16.msra.mxu1 %v2023_v24  ;;  %4716 = vmatprep.mubr.msk.bf16.mxu1 %vm1125_vm12, %v5128_v23  ;;  %v1527_v13 = vsel %vm1132_vm13, %v1519_v36, 0  ;;  %v5160_v23 = vld [vmem:[%s5934_s6] sm:$0xff]  }
 0x408   :  { %5036 = vmatprep.subr.msk.bf16.mxu1 %vm1132_vm13, %v2097_v25 }
 0x409   :  { %v2257_v39 = vpop.permute.xlu1 %2256 }
 0x40a   :  { %v1598_v42 = vpop.permute.xlu0 %1597  ;;  %v2265_v44 = vsel %vm1132_vm13, %v2257_v39, 0 }
 0x40b   :  { %v1606_v48 = vsel %vm1132_vm13, %v1598_v42, 0 }
 0x40d   :  { %v2335_v45 = vpop.permute.xlu1 %2334 }
 0x40e   :  { %4663 = vmatmul.mubr.msk.bf16.vlgmr.msra.gmra.mrb[8].mxu0 %vm1125_vm12, %v5127_v26  ;;  %v1677_v50 = vpop.permute.xlu0 %1676  ;;  %v2343_v52 = vsel %vm1132_vm13, %v2335_v45, 0  ;;  %v5159_v26 = vld [vmem:[%s5934_s6 + $0x8] sm:$0xff]  }
 0x40f   :  { %4667 = vmatpush3.bf16.msra.mxu0 %v1365_v28  ;;  %4668 = vmatprep.mubr.msk.bf16.mxu0 %vm1125_vm12, %v5130_v27  ;;  %v1685_v56 = vsel %vm1132_vm13, %v1677_v50, 0  ;;  %v5162_v27 = vld [vmem:[%s5934_s6 + $0x20] sm:$0xff]  }
 0x410   :  { %5028 = vmatprep.subr.msk.bf16.mxu0 %vm1132_vm13, %v1440_v30 }
 0x411   :  { %v2413_v53 = vpop.permute.xlu1 %2412 }
 0x412   :  { %4717 = vmatmul.mubr.msk.bf16.vlgmr.msra.gmra.mrb[4].mxu1 %vm1125_vm12, %v5129_v29  ;;  %v1756_v58 = vpop.permute.xlu0 %1755  ;;  %v2421_v60 = vsel %vm1132_vm13, %v2413_v53, 0  ;;  %v5161_v29 = vld [vmem:[%s5934_s6 + $0x8] sm:$0xff]  }
 0x413   :  { %4721 = vmatpush3.bf16.msra.mxu1 %v2105_v32  ;;  %4722 = vmatprep.mubr.msk.bf16.mxu1 %vm1125_vm12, %v5132_v31  ;;  %v1764_v0 = vsel %vm1132_vm13, %v1756_v58, 0  ;;  %v5164_v31 = vld [vmem:[%s5934_s6 + $0x20] sm:$0xff]  }
 0x414   :  { %5037 = vmatprep.subr.msk.bf16.mxu1 %vm1132_vm13, %v2179_v33 }
 0x415   :  { %v2491_v61 = vpop.permute.xlu1 %2490 }
 0x416   :  { %v2602_v2 = vpop.permute.xlu0 %2601  ;;  %v2499_v4 = vsel %vm1132_vm13, %v2491_v61, 0 }
 0x417   :  { %v2610_v9 = vsel %vm1132_vm13, %v2602_v2, 0 }
 0x419   :  { %v3336_v5 = vpop.permute.xlu1 %3335 }
 0x41a   :  { %4669 = vmatmul.mubr.msk.bf16.vlgmr.msra.gmra.mrb[8].mxu0 %vm1125_vm12, %v5131_v7  ;;  %v2675_v14 = vpop.permute.xlu0 %2674  ;;  %v3344_v16 = vsel %vm1132_vm13, %v3336_v5, 0  ;;  %v5163_v7 = vld [vmem:[%s5934_s6 + $0x28] sm:$0xff]  }
 0x41b   :  { %4673 = vmatpush3.bf16.msra.mxu0 %v1448_v35  ;;  %4674 = vmatprep.mubr.msk.bf16.mxu0 %vm1125_vm12, %v5134_v34  ;;  %v2683_v20 = vsel %vm1132_vm13, %v2675_v14, 0  ;;  %v5166_v34 = vld [vmem:[%s5934_s6 + $0x30] sm:$0xff]  }
 0x41c   :  { %5029 = vmatprep.subr.msk.bf16.mxu0 %vm1132_vm13, %v1519_v36 }
 0x41d   :  { %v3409_v18 = vpop.permute.xlu1 %3408 }
 0x41e   :  { %4723 = vmatmul.mubr.msk.bf16.vlgmr.msra.gmra.mrb[4].mxu1 %vm1125_vm12, %v5133_v10  ;;  %v2749_v22 = vpop.permute.xlu0 %2748  ;;  %v3417_v24 = vsel %vm1132_vm13, %v3409_v18, 0  ;;  %v5165_v10 = vld [vmem:[%s5934_s6 + $0x28] sm:$0xff]  }
 0x41f   :  { %4727 = vmatpush3.bf16.msra.mxu1 %v2187_v38  ;;  %4728 = vmatprep.mubr.msk.bf16.mxu1 %vm1125_vm12, %v5136_v37  ;;  %v2757_v28 = vsel %vm1132_vm13, %v2749_v22, 0  ;;  %v5168_v37 = vld [vmem:[%s5934_s6 + $0x30] sm:$0xff]  }
 0x420   :  { %5038 = vmatprep.subr.msk.bf16.mxu1 %vm1132_vm13, %v2257_v39 }
 0x421   :  { %v3483_v25 = vpop.permute.xlu1 %3482 }
 0x422   :  { %v2831_v30 = vpop.permute.xlu0 %2830  ;;  %v3491_v32 = vsel %vm1132_vm13, %v3483_v25, 0 }
 0x423   :  { %v2839_v35 = vsel %vm1132_vm13, %v2831_v30, 0 }
 0x425   :  { %v3565_v33 = vpop.permute.xlu1 %3564 }
 0x426   :  { %4675 = vmatmul.mubr.msk.bf16.vlgmr.msra.gmra.mrb[8].mxu0 %vm1125_vm12, %v5135_v40  ;;  %v2913_v36 = vpop.permute.xlu0 %2912  ;;  %v3573_v38 = vsel %vm1132_vm13, %v3565_v33, 0  ;;  %v5167_v40 = vld [vmem:[%s5934_s6 + $0x38] sm:$0xff]  }
 0x427   :  { %4679 = vmatpush3.bf16.msra.mxu0 %v1527_v13  ;;  %4680 = vmatprep.mubr.msk.bf16.mxu0 %vm1125_vm12, %v5138_v41  ;;  %v5170_v41 = vld [vmem:[%s5934_s6 + $0x40] sm:$0xff]   ;;  %v2921_v13 = vsel %vm1132_vm13, %v2913_v36, 0 }
 0x428   :  { %5030 = vmatprep.subr.msk.bf16.mxu0 %vm1132_vm13, %v1598_v42 }
 0x429   :  { %v3647_v39 = vpop.permute.xlu1 %3646 }
 0x42a   :  { %4729 = vmatmul.mubr.msk.bf16.vlgmr.msra.gmra.mrb[4].mxu1 %vm1125_vm12, %v5137_v12  ;;  %v5169_v12 = vld [vmem:[%s5934_s6 + $0x38] sm:$0xff]   ;;  %v2991_v42 = vpop.permute.xlu0 %2990 }
 0x42b   :  { %4733 = vmatpush3.bf16.msra.mxu1 %v2265_v44  ;;  %4734 = vmatprep.mubr.msk.bf16.mxu1 %vm1125_vm12, %v5140_v43  ;;  %v5172_v43 = vld [vmem:[%s5934_s6 + $0x40] sm:$0xff]   ;;  %v3655_v44 = vsel %vm1132_vm13, %v3647_v39, 0 }
 0x42c   :  { %5039 = vmatprep.subr.msk.bf16.mxu1 %vm1132_vm13, %v2335_v45 }
 0x42d   :  { %v3725_v45 = vpop.permute.xlu1 %3724 }
 0x432   :  { %4681 = vmatmul.mubr.msk.bf16.vlgmr.msra.gmra.mrb[8].mxu0 %vm1125_vm12, %v5139_v46  ;;  %v5171_v46 = vld [vmem:[%s5934_s6 + $0x48] sm:$0xff]  }
 0x433   :  { %4685 = vmatpush3.bf16.msra.mxu0 %v1606_v48  ;;  %4686 = vmatprep.mubr.msk.bf16.mxu0 %vm1125_vm12, %v5142_v47  ;;  %v5174_v47 = vld [vmem:[%s5934_s6 + $0x50] sm:$0xff]   ;;  %v2999_v48 = vsel %vm1132_vm13, %v2991_v42, 0 }
 0x434   :  { %5031 = vmatprep.subr.msk.bf16.mxu0 %vm1132_vm13, %v1677_v50  ;;  %v3069_v50 = vpop.permute.xlu0 %3068 }
 0x436   :  { %4735 = vmatmul.mubr.msk.bf16.vlgmr.msra.gmra.mrb[4].mxu1 %vm1125_vm12, %v5141_v49  ;;  %v5173_v49 = vld [vmem:[%s5934_s6 + $0x48] sm:$0xff]  }
 0x437   :  { %4739 = vmatpush3.bf16.msra.mxu1 %v2343_v52  ;;  %4740 = vmatprep.mubr.msk.bf16.mxu1 %vm1125_vm12, %v5144_v51  ;;  %v5176_v51 = vld [vmem:[%s5934_s6 + $0x50] sm:$0xff]   ;;  %v3733_v52 = vsel %vm1132_vm13, %v3725_v45, 0 }
 0x438   :  { %5040 = vmatprep.subr.msk.bf16.mxu1 %vm1132_vm13, %v2413_v53  ;;  %v3803_v53 = vpop.permute.xlu1 %3802 }
 0x43e   :  { %4687 = vmatmul.mubr.msk.bf16.vlgmr.msra.gmra.mrb[8].mxu0 %vm1125_vm12, %v5143_v54  ;;  %v5175_v54 = vld [vmem:[%s5934_s6 + $0x58] sm:$0xff]  }
 0x43f   :  { %4691 = vmatpush3.bf16.msra.mxu0 %v1685_v56  ;;  %4692 = vmatprep.mubr.msk.bf16.mxu0 %vm1125_vm12, %v5146_v55  ;;  %v5178_v55 = vld [vmem:[%s5934_s6 + $0x60] sm:$0xff]   ;;  %v3077_v56 = vsel %vm1132_vm13, %v3069_v50, 0 }
 0x440   :  { %5032 = vmatprep.subr.msk.bf16.mxu0 %vm1132_vm13, %v1756_v58  ;;  %v3147_v58 = vpop.permute.xlu0 %3146 }
 0x442   :  { %4741 = vmatmul.mubr.msk.bf16.vlgmr.msra.gmra.mrb[4].mxu1 %vm1125_vm12, %v5145_v57  ;;  %v5177_v57 = vld [vmem:[%s5934_s6 + $0x58] sm:$0xff]  }
 0x443   :  { %4745 = vmatpush3.bf16.msra.mxu1 %v2421_v60  ;;  %4746 = vmatprep.mubr.msk.bf16.mxu1 %vm1125_vm12, %v5148_v59  ;;  %v5180_v59 = vld [vmem:[%s5934_s6 + $0x60] sm:$0xff]   ;;  %v3811_v60 = vsel %vm1132_vm13, %v3803_v53, 0 }
 0x444   :  { %5041 = vmatprep.subr.msk.bf16.mxu1 %vm1132_vm13, %v2491_v61  ;;  %v3881_v61 = vpop.permute.xlu1 %3880 }
 0x44a   :  { %4693 = vmatmul.mubr.msk.bf16.vlgmr.msra.gmra.mrb[8].mxu0 %vm1125_vm12, %v5147_v62  ;;  %v5179_v62 = vld [vmem:[%s5934_s6 + $0x68] sm:$0xff]  }
 0x44b   :  { %4697 = vmatpush3.bf16.msra.mxu0 %v1764_v0  ;;  %4698 = vmatprep.mubr.msk.bf16.mxu0 %vm1125_vm12, %v5150_v63  ;;  %v5182_v63 = vld [vmem:[%s5934_s6 + $0x70] sm:$0xff]   ;;  %v3155_v0 = vsel %vm1132_vm13, %v3147_v58, 0 }
 0x44c   :  { %5042 = vmatprep.subr.msk.bf16.mxu0 %vm1132_vm13, %v2602_v2  ;;  %v3225_v2 = vpop.permute.xlu0 %3224 }
 0x44e   :  { %4747 = vmatmul.mubr.msk.bf16.vlgmr.msra.gmra.mrb[4].mxu1 %vm1125_vm12, %v5149_v1  ;;  %v5181_v1 = vld [vmem:[%s5934_s6 + $0x68] sm:$0xff]  }
 0x44f   :  { %4751 = vmatpush3.bf16.msra.mxu1 %v2499_v4  ;;  %4752 = vmatprep.mubr.msk.bf16.mxu1 %vm1125_vm12, %v5152_v3  ;;  %v5184_v3 = vld [vmem:[%s5934_s6 + $0x70] sm:$0xff]   ;;  %v3889_v4 = vsel %vm1132_vm13, %v3881_v61, 0 }
 0x450   :  { %5051 = vmatprep.subr.msk.bf16.mxu1 %vm1132_vm13, %v3336_v5  ;;  %v3959_v5 = vpop.permute.xlu1 %3958 }
 0x456   :  { %4699 = vmatmul.mubr.msk.bf16.vlgmr.msra.gmra.mrb[8].mxu0 %vm1125_vm12, %v5151_v6  ;;  %v5183_v6 = vld [vmem:[%s5934_s6 + $0x78] sm:$0xff]  }
 0x457   :  { %4757 = vmatpush3.bf16.msra.mxu0 %v2610_v9  ;;  %4758 = vmatprep.mubr.msk.bf16.mxu0 %vm1125_vm12, %v5154_v8  ;;  %v5186_v8 = vld [vmem:[%s5934_s6 + $0x80] sm:$0xff]   ;;  %v3233_v9 = vsel %vm1132_vm13, %v3225_v2, 0 }
 0x458   :  { %5043 = vmatprep.subr.msk.bf16.mxu0 %vm1132_vm13, %v2675_v14  ;;  %v5188_v14 = vld [vmem:[%s5934_s6 + $0x80] sm:$0xff]  }
 0x45a   :  { %4753 = vmatmul.mubr.msk.bf16.vlgmr.msra.gmra.mrb[4].mxu1 %vm1125_vm12, %v5153_v11  ;;  %v5185_v11 = vld [vmem:[%s5934_s6 + $0x78] sm:$0xff]  }
 0x45b   :  { %4811 = vmatpush3.bf16.msra.mxu1 %v3344_v16  ;;  %4812 = vmatprep.mubr.msk.bf16.mxu1 %vm1125_vm12, %v5156_v15  ;;  %v3967_v15 = vsel %vm1132_vm13, %v3959_v5, 0  ;;  %v5187_v16 = vld [vmem:[%s5934_s6 + $0x88] sm:$0xff]  }
 0x45c   :  { %5052 = vmatprep.subr.msk.bf16.mxu1 %vm1132_vm13, %v3409_v18 }
 0x45e   :  { %4759 = vmatmul.mubr.msk.bf16.vlgmr.msra.gmra.mrb[12].mxu0 %vm1125_vm12, %v5155_v17  ;;  %v5189_v17 = vld [vmem:[%s5934_s6 + $0x88] sm:$0xff]  }
 0x45f   :  { %4763 = vmatpush3.bf16.msra.mxu0 %v2683_v20  ;;  %4764 = vmatprep.mubr.msk.bf16.mxu0 %vm1125_vm12, %v5158_v19 }
 0x460   :  { %5044 = vmatprep.subr.msk.bf16.mxu0 %vm1132_vm13, %v2749_v22 }
 0x462   :  { %4813 = vmatmul.mubr.msk.bf16.vlgmr.msra.gmra.mrb[8].mxu1 %vm1125_vm12, %v5157_v21 }
 0x463   :  { %4817 = vmatpush3.bf16.msra.mxu1 %v3417_v24  ;;  %4818 = vmatprep.mubr.msk.bf16.mxu1 %vm1125_vm12, %v5160_v23 }
 0x464   :  { %5053 = vmatprep.subr.msk.bf16.mxu1 %vm1132_vm13, %v3483_v25 }
 0x46a   :  { %4765 = vmatmul.mubr.msk.bf16.vlgmr.msra.gmra.mrb[12].mxu0 %vm1125_vm12, %v5159_v26 }
 0x46b   :  { %4769 = vmatpush3.bf16.msra.mxu0 %v2757_v28  ;;  %4770 = vmatprep.mubr.msk.bf16.mxu0 %vm1125_vm12, %v5162_v27 }
 0x46c   :  { %5045 = vmatprep.subr.msk.bf16.mxu0 %vm1132_vm13, %v2831_v30 }
 0x46e   :  { %4819 = vmatmul.mubr.msk.bf16.vlgmr.msra.gmra.mrb[8].mxu1 %vm1125_vm12, %v5161_v29 }
 0x46f   :  { %4823 = vmatpush3.bf16.msra.mxu1 %v3491_v32  ;;  %4824 = vmatprep.mubr.msk.bf16.mxu1 %vm1125_vm12, %v5164_v31 }
 0x470   :  { %5054 = vmatprep.subr.msk.bf16.mxu1 %vm1132_vm13, %v3565_v33 }
 0x476   :  { %4771 = vmatmul.mubr.msk.bf16.vlgmr.msra.gmra.mrb[12].mxu0 %vm1125_vm12, %v5163_v7 }
 0x477   :  { %4775 = vmatpush3.bf16.msra.mxu0 %v2839_v35  ;;  %4776 = vmatprep.mubr.msk.bf16.mxu0 %vm1125_vm12, %v5166_v34 }
 0x478   :  { %5046 = vmatprep.subr.msk.bf16.mxu0 %vm1132_vm13, %v2913_v36 }
 0x47a   :  { %4825 = vmatmul.mubr.msk.bf16.vlgmr.msra.gmra.mrb[8].mxu1 %vm1125_vm12, %v5165_v10 }
 0x47b   :  { %4829 = vmatpush3.bf16.msra.mxu1 %v3573_v38  ;;  %4830 = vmatprep.mubr.msk.bf16.mxu1 %vm1125_vm12, %v5168_v37 }
 0x47c   :  { %5055 = vmatprep.subr.msk.bf16.mxu1 %vm1132_vm13, %v3647_v39 }
 0x482   :  { %4777 = vmatmul.mubr.msk.bf16.vlgmr.msra.gmra.mrb[12].mxu0 %vm1125_vm12, %v5167_v40 }
 0x483   :  { %4781 = vmatpush3.bf16.msra.mxu0 %v2921_v13  ;;  %4782 = vmatprep.mubr.msk.bf16.mxu0 %vm1125_vm12, %v5170_v41 }
 0x484   :  { %5047 = vmatprep.subr.msk.bf16.mxu0 %vm1132_vm13, %v2991_v42 }
 0x486   :  { %4831 = vmatmul.mubr.msk.bf16.vlgmr.msra.gmra.mrb[8].mxu1 %vm1125_vm12, %v5169_v12 }
 0x487   :  { %4835 = vmatpush3.bf16.msra.mxu1 %v3655_v44  ;;  %4836 = vmatprep.mubr.msk.bf16.mxu1 %vm1125_vm12, %v5172_v43 }
 0x488   :  { %5056 = vmatprep.subr.msk.bf16.mxu1 %vm1132_vm13, %v3725_v45 }
 0x48e   :  { %4783 = vmatmul.mubr.msk.bf16.vlgmr.msra.gmra.mrb[12].mxu0 %vm1125_vm12, %v5171_v46 }
 0x48f   :  { %4787 = vmatpush3.bf16.msra.mxu0 %v2999_v48  ;;  %4788 = vmatprep.mubr.msk.bf16.mxu0 %vm1125_vm12, %v5174_v47 }
 0x490   :  { %5048 = vmatprep.subr.msk.bf16.mxu0 %vm1132_vm13, %v3069_v50 }
 0x492   :  { %4837 = vmatmul.mubr.msk.bf16.vlgmr.msra.gmra.mrb[8].mxu1 %vm1125_vm12, %v5173_v49 }
 0x493   :  { %4841 = vmatpush3.bf16.msra.mxu1 %v3733_v52  ;;  %4842 = vmatprep.mubr.msk.bf16.mxu1 %vm1125_vm12, %v5176_v51 }
 0x494   :  { %5057 = vmatprep.subr.msk.bf16.mxu1 %vm1132_vm13, %v3803_v53 }
 0x49a   :  { %4789 = vmatmul.mubr.msk.bf16.vlgmr.msra.gmra.mrb[12].mxu0 %vm1125_vm12, %v5175_v54 }
 0x49b   :  { %4793 = vmatpush3.bf16.msra.mxu0 %v3077_v56  ;;  %4794 = vmatprep.mubr.msk.bf16.mxu0 %vm1125_vm12, %v5178_v55 }
 0x49c   :  { %5049 = vmatprep.subr.msk.bf16.mxu0 %vm1132_vm13, %v3147_v58 }
 0x49e   :  { %4843 = vmatmul.mubr.msk.bf16.vlgmr.msra.gmra.mrb[8].mxu1 %vm1125_vm12, %v5177_v57 }
 0x49f   :  { %4847 = vmatpush3.bf16.msra.mxu1 %v3811_v60  ;;  %4848 = vmatprep.mubr.msk.bf16.mxu1 %vm1125_vm12, %v5180_v59 }
 0x4a0   :  { %5058 = vmatprep.subr.msk.bf16.mxu1 %vm1132_vm13, %v3881_v61 }
 0x4a6   :  { %4795 = vmatmul.mubr.msk.bf16.vlgmr.msra.gmra.mrb[12].mxu0 %vm1125_vm12, %v5179_v62 }
 0x4a7   :  { %4799 = vmatpush3.bf16.msra.mxu0 %v3155_v0  ;;  %4800 = vmatprep.mubr.msk.bf16.mxu0 %vm1125_vm12, %v5182_v63 }
 0x4a8   :  { %5050 = vmatprep.subr.msk.bf16.mxu0 %vm1132_vm13, %v3225_v2 }
 0x4aa   :  { %4849 = vmatmul.mubr.msk.bf16.vlgmr.msra.gmra.mrb[8].mxu1 %vm1125_vm12, %v5181_v1 }
 0x4ab   :  { %4853 = vmatpush3.bf16.msra.mxu1 %v3889_v4  ;;  %4854 = vmatprep.mubr.msk.bf16.mxu1 %vm1125_vm12, %v5184_v3 }
 0x4ac   :  { %5059 = vmatprep.subr.msk.bf16.mxu1 %vm1132_vm13, %v3959_v5 }
 0x4b2   :  { %4801 = vmatmul.mubr.msk.bf16.vlgmr.msra.gmra.mrb[12].mxu0 %vm1125_vm12, %v5183_v6 }
 0x4b3   :  { %4805 = vmatpush3.bf16.msra.mxu0 %v3233_v9  ;;  %4806 = vmatprep.mubr.msk.bf16.mxu0 %vm1125_vm12, %v5186_v8 }
 0x4b6   :  { %4855 = vmatmul.mubr.msk.bf16.vlgmr.msra.gmra.mrb[8].mxu1 %vm1125_vm12, %v5185_v11 }
 0x4b7   :  { %4859 = vmatpush3.bf16.msra.mxu1 %v3967_v15  ;;  %4860 = vmatprep.mubr.msk.bf16.mxu1 %vm1125_vm12, %v5188_v14 }
 0x4be   :  { %4807 = vmatmul.mubr.msk.bf16.vlgmr.msra.gmra.mrb[12].mxu0 %vm1125_vm12, %v5187_v16 }
 0x4c2   :  { %4861 = vmatmul.mubr.msk.bf16.vlgmr.msra.gmra.mrb[8].mxu1 %vm1125_vm12, %v5189_v17 }
 0x529   :  { %v4700_v18 = vpop.f32.mrb[8].mxu0 }
 0x52a   :  { %5218 = vtanh.f32 %v4700_v18  ;;  %v1800_v19 = vpop.f32.mrb[9].mxu0 }
 0x52b   :  { %v4701_v20 = vpop.f32.mrb[10].mxu0 }
 0x52c   :  { %5220 = vtanh.f32 %v4701_v20  ;;  %v1803_v21 = vpop.f32.mrb[11].mxu0 }
 0x52d   :  { %v4754_v22 = vpop.f32.mrb[4].mxu1  ;;  %5222 = vtanh.f32 %v1800_v19 }
 0x52e   :  { %v2535_v23 = vpop.f32.mrb[5].mxu1  ;;  %5224 = vtanh.f32 %v1803_v21 }
 0x52f   :  { %v4755_v24 = vpop.f32.mrb[6].mxu1  ;;  %5226 = vtanh.f32 %v4754_v22 }
 0x530   :  { %v2538_v25 = vpop.f32.mrb[7].mxu1  ;;  %5228 = vtanh.f32 %v4755_v24 }
 0x531   :  { %5230 = vtanh.f32 %v2535_v23 }
 0x532   :  { %5232 = vtanh.f32 %v2538_v25 }
 0x534   :  { %v5219_v26 = vpop.eup %5218 }
 0x535   :  { %1831 = vrot.lane.b32.xlu0 %v5219_v26, %s5262_s8 }
 0x536   :  { %v5221_v27 = vpop.eup %5220 }
 0x537   :  { %1833 = vrot.lane.b32.xlu1 %v5221_v27, %s5262_s8  ;;  %v5223_v28 = vpop.eup %5222 }
 0x538   :  { %v5225_v29 = vpop.eup %5224 }
 0x539   :  { %1827 = vrot.lane.b32.xlu0 %v5223_v28, %s5262_s8  ;;  %v5227_v30 = vpop.eup %5226 }
 0x53a   :  { %v5229_v31 = vpop.eup %5228 }
 0x53b   :  { %1829 = vrot.lane.b32.xlu1 %v5225_v29, %s5262_s8  ;;  %v5231_v32 = vpop.eup %5230 }
 0x53c   :  { %v5233_v33 = vpop.eup %5232 }
 0x53d   :  { %2566 = vrot.lane.b32.xlu0 %v5227_v30, %s5262_s8 }
 0x53f   :  { %2568 = vrot.lane.b32.xlu1 %v5229_v31, %s5262_s8 }
 0x541   :  { %2562 = vrot.lane.b32.xlu0 %v5231_v32, %s5262_s8 }
 0x543   :  { %2564 = vrot.lane.b32.xlu1 %v5233_v33, %s5262_s8 }
 0x591   :  { %v4808_v7 = vpop.f32.mrb[12].mxu0 }
 0x592   :  { %5234 = vtanh.f32 %v4808_v7  ;;  %v3269_v34 = vpop.f32.mrb[13].mxu0 }
 0x593   :  { %v4809_v35 = vpop.f32.mrb[14].mxu0 }
 0x594   :  { %5236 = vtanh.f32 %v4809_v35  ;;  %v3272_v10 = vpop.f32.mrb[15].mxu0 }
 0x595   :  { %v4862_v36 = vpop.f32.mrb[8].mxu1  ;;  %5238 = vtanh.f32 %v3269_v34 }
 0x596   :  { %v4003_v37 = vpop.f32.mrb[9].mxu1  ;;  %5240 = vtanh.f32 %v3272_v10 }
 0x597   :  { %v4863_v38 = vpop.f32.mrb[10].mxu1  ;;  %5242 = vtanh.f32 %v4003_v37 }
 0x598   :  { %v4006_v39 = vpop.f32.mrb[11].mxu1 }
 0x599   :  { %5244 = vtanh.f32 %v4006_v39 }
 0x59a   :  { %5246 = vtanh.f32 %v4862_v36 }
 0x59b   :  { %5248 = vtanh.f32 %v4863_v38 }
 0x59c   :  { %v5235_v40 = vpop.eup %5234 }
 0x59d   :  { %3300 = vrot.lane.b32.xlu0 %v5235_v40, %s5262_s8 }
 0x59e   :  { %v5237_v41 = vpop.eup %5236 }
 0x59f   :  { %3302 = vrot.lane.b32.xlu1 %v5237_v41, %s5262_s8  ;;  %v5239_v13 = vpop.eup %5238 }
 0x5a0   :  { %v5241_v12 = vpop.eup %5240 }
 0x5a1   :  { %3296 = vrot.lane.b32.xlu0 %v5239_v13, %s5262_s8  ;;  %v5243_v42 = vpop.eup %5242 }
 0x5a3   :  { %3298 = vrot.lane.b32.xlu1 %v5241_v12, %s5262_s8  ;;  %v5245_v43 = vpop.eup %5244 }
 0x5a4   :  { %v5247_v45 = vpop.eup %5246 }
 0x5a5   :  { %4030 = vrot.lane.b32.xlu0 %v5243_v42, %s5262_s8  ;;  %v5249_v47 = vpop.eup %5248 }
 0x5a7   :  { %v1832_v44 = vpop.permute.xlu0 %1831  ;;  %4032 = vrot.lane.b32.xlu1 %v5245_v43, %s5262_s8 }
 0x5a8   :  { %1842 = vst.msk [vmem:[%s5935_s7 + $0x10] sm:$0xff] %vm1839_vm14, %v1832_v44 }
 0x5a9   :  { %4034 = vrot.lane.b32.xlu0 %v5247_v45, %s5262_s8  ;;  %v1834_v46 = vpop.permute.xlu1 %1833 }
 0x5aa   :  { %1843 = vst.msk [vmem:[%s5935_s7 + $0x18] sm:$0xff] %vm1839_vm14, %v1834_v46 }
 0x5ab   :  { %v1828_v48 = vpop.permute.xlu0 %1827  ;;  %4036 = vrot.lane.b32.xlu1 %v5249_v47, %s5262_s8 }
 0x5ac   :  { %1840 = vst.msk [vmem:[%s5935_s7] sm:$0xff] %vm1839_vm14, %v1828_v48 }
 0x5ad   :  { %v1830_v49 = vpop.permute.xlu1 %1829 }
 0x5ae   :  { %1841 = vst.msk [vmem:[%s5935_s7 + $0x8] sm:$0xff] %vm1839_vm14, %v1830_v49 }
 0x5af   :  { %v2567_v50 = vpop.permute.xlu0 %2566 }
 0x5b0   :  { %2576 = vst.msk [vmem:[%s5935_s7 + $0x30] sm:$0xff] %vm1839_vm14, %v2567_v50 }
 0x5b1   :  { %v2569_v51 = vpop.permute.xlu1 %2568 }
 0x5b2   :  { %2577 = vst.msk [vmem:[%s5935_s7 + $0x38] sm:$0xff] %vm1839_vm14, %v2569_v51 }
 0x5b3   :  { %v2563_v52 = vpop.permute.xlu0 %2562 }
 0x5b4   :  { %2574 = vst.msk [vmem:[%s5935_s7 + $0x20] sm:$0xff] %vm1839_vm14, %v2563_v52 }
 0x5b5   :  { %v2565_v53 = vpop.permute.xlu1 %2564 }
 0x5b6   :  { %2575 = vst.msk [vmem:[%s5935_s7 + $0x28] sm:$0xff] %vm1839_vm14, %v2565_v53 }
 0x60f   :  { %v3301_v54 = vpop.permute.xlu0 %3300 }
 0x610   :  { %3310 = vst.msk [vmem:[%s5935_s7 + $0x50] sm:$0xff] %vm1839_vm14, %v3301_v54 }
 0x611   :  { %v3303_v55 = vpop.permute.xlu1 %3302 }
 0x612   :  { %3311 = vst.msk [vmem:[%s5935_s7 + $0x58] sm:$0xff] %vm1839_vm14, %v3303_v55 }
 0x613   :  { %v3297_v56 = vpop.permute.xlu0 %3296 }
 0x614   :  { %3308 = vst.msk [vmem:[%s5935_s7 + $0x40] sm:$0xff] %vm1839_vm14, %v3297_v56 }
 0x615   :  { %v3299_v57 = vpop.permute.xlu1 %3298 }
 0x616   :  { %3309 = vst.msk [vmem:[%s5935_s7 + $0x48] sm:$0xff] %vm1839_vm14, %v3299_v57 }
 0x617   :  { %v4031_v58 = vpop.permute.xlu0 %4030 }
 0x618   :  { %4042 = vst.msk [vmem:[%s5935_s7 + $0x60] sm:$0xff] %vm1839_vm14, %v4031_v58 }
 0x619   :  { %v4033_v59 = vpop.permute.xlu1 %4032 }
 0x61a   :  { %4043 = vst.msk [vmem:[%s5935_s7 + $0x68] sm:$0xff] %vm1839_vm14, %v4033_v59 }
 0x61b   :  { %v4035_v60 = vpop.permute.xlu0 %4034 }
 0x61c   :  { %4044 = vst.msk [vmem:[%s5935_s7 + $0x70] sm:$0xff] %vm1839_vm14, %v4035_v60 }
 0x61d   :  { %v4037_v61 = vpop.permute.xlu1 %4036 }
 0x61e   :  { %4045 = vst.msk [vmem:[%s5935_s7 + $0x78] sm:$0xff] %vm1839_vm14, %v4037_v61 }

</bundles_post_ra>
